<compile_context>
chip_gen: v6e
topology: v6e:2x2x1
jax: 0.10.0
libtpu: 0.0.40
codegen_flags: <defaults>
</compile_context>

<pallas_src>
import jax
import jax.numpy as jnp
from jax.experimental import pallas as pl
from jax.experimental.pallas import tpu as pltpu


def _make_conv_shuffle_prelu_kernel(TH, W, Cin, Cout, K, r):
    Cpost = Cout // (r * r)
    rC = r * Cpost  # lane width of each stored slab (128 in the real SRGAN block)

    def kernel(x_ref, w_ref, b_ref, a_ref, o_ref):
        # x_ref: (1, H+K-1, W+K-1, Cin) bf16  whole padded image (resident per n)
        # w_ref: (K*K*Cin, Cout)        bf16  tap-major, out-channels in (i,j,c) order
        # b_ref: (1, Cout)              f32   bias, same channel order
        # a_ref: (1,)                   f32   PReLU alpha (SMEM scalar)
        # o_ref: (1, TH, r, W, r*Cpost) f32   row tile of the pre-reshape shuffle layout
        t = pl.program_id(1)
        row0 = pl.multiple_of(t * TH, TH)

        # --- im2col: build (TH*W, K*K*Cin) patch matrix, single MXU contraction ---
        cols = []
        for kh in range(K):
            for kw in range(K):
                patch = x_ref[0, pl.ds(row0 + kh, TH), kw:kw + W, :]   # (TH, W, Cin)
                cols.append(patch.reshape(TH * W, Cin))
        patches = jnp.concatenate(cols, axis=1)                        # (TH*W, K*K*Cin)

        acc = jnp.dot(patches, w_ref[...],
                      preferred_element_type=jnp.float32)              # (TH*W, Cout) f32
        acc = acc + b_ref[...]                                         # bias, added once
        alpha = a_ref[0]
        acc = jnp.where(acc >= 0, acc, alpha * acc)                    # PReLU (shared a)

        # --- fused PixelShuffle store ---
        # Channel order (i, j, c): output rows with row-phase i are exactly the
        # contiguous lane slab acc[:, i*rC:(i+1)*rC]; store it at leading index i.
        # The (j, c) interleave along W becomes a pure reshape outside the kernel.
        for i in range(r):
            slab = acc[:, i * rC:(i + 1) * rC]                         # (TH*W, r*Cpost)
            o_ref[0, :, i, :, :] = slab.reshape(TH, W, rC)

    return kernel


def subpixel_conv_block(x_nchw, conv_w, conv_b, prelu_alpha, *,
                        scaling_factor=2, block_h=8,
                        compute_dtype=jnp.bfloat16):
    """x_nchw: (N, Cin, H, W); conv_w: (Cout, Cin, K, K) torch layout; conv_b: (Cout,)."""
    N, Cin, H, W = x_nchw.shape
    Cout, _, K, _ = conv_w.shape
    pad = K // 2
    r = scaling_factor
    Cpost = Cout // (r * r)

    TH = min(block_h, H)
    assert H % TH == 0, "block_h must divide H"

    # --- interface glue: NCHW -> NHWC (lane-dense channels) + zero same-pad ---
    x_nhwc = jnp.transpose(x_nchw, (0, 2, 3, 1)).astype(compute_dtype)
    x_pad = jnp.pad(x_nhwc, ((0, 0), (pad, pad), (pad, pad), (0, 0)))

    # --- weights: permute out-channels from torch's (c, i, j) to (i, j, c), then
    #     lay out tap-major (K*K*Cin, Cout) for the im2col contraction ---
    w_perm = conv_w.reshape(Cpost, r, r, Cin, K, K)
    w_perm = jnp.transpose(w_perm, (1, 2, 0, 3, 4, 5)).reshape(Cout, Cin, K, K)
    w_flat = jnp.transpose(w_perm, (2, 3, 1, 0)).reshape(K * K * Cin, Cout)
    w_flat = w_flat.astype(compute_dtype)
    b_perm = jnp.transpose(conv_b.reshape(Cpost, r, r), (1, 2, 0))
    b_perm = b_perm.reshape(1, Cout).astype(jnp.float32)
    a1 = jnp.asarray(prelu_alpha, jnp.float32).reshape(1,)

    kernel = _make_conv_shuffle_prelu_kernel(TH, W, Cin, Cout, K, r)

    out = pl.pallas_call(
        kernel,
        out_shape=jax.ShapeDtypeStruct((N, H, r, W, r * Cpost), jnp.float32),
        grid_spec=pltpu.PrefetchScalarGridSpec(
            num_scalar_prefetch=0,
            grid=(N, H // TH),
            in_specs=[
                # whole padded image; block index depends only on n -> stays
                # resident in VMEM across the row tiles of one image
                pl.BlockSpec((1, H + 2 * pad, W + 2 * pad, Cin),
                             lambda n, t: (n, 0, 0, 0)),
                pl.BlockSpec((K * K * Cin, Cout), lambda n, t: (0, 0)),
                pl.BlockSpec((1, Cout), lambda n, t: (0, 0)),
                pl.BlockSpec(memory_space=pltpu.MemorySpace.SMEM),
            ],
            out_specs=pl.BlockSpec((1, TH, r, W, r * Cpost),
                                   lambda n, t: (n, t, 0, 0, 0)),
        ),
        compiler_params=pltpu.CompilerParams(
            dimension_semantics=("parallel", "parallel"),
            vmem_limit_bytes=32 * 1024 * 1024),
    )(x_pad, w_flat, b_perm, a1)

    # Finish PixelShuffle: (N, H, r, W, r, Cpost) -> (N, H*r, W*r, Cpost) is a
    # pure contiguous reshape (free), then NCHW for the PyTorch interface.
    y = out.reshape(N, H * r, W * r, Cpost)
    return jnp.transpose(y, (0, 3, 1, 2))


def _reference(x, w, b, alpha, r, compute_dtype=jnp.bfloat16):
    """Pure-JAX reference reproducing the PyTorch forward (bf16 matmul inputs,
    f32 accumulation, to match the kernel's numerics)."""
    N, Cin, H, W = x.shape
    Cout = w.shape[0]
    Cpost = Cout // (r * r)
    y = jax.lax.conv_general_dilated(
        x.astype(compute_dtype), w.astype(compute_dtype),
        window_strides=(1, 1), padding="SAME",
        dimension_numbers=("NCHW", "OIHW", "NCHW"),
        preferred_element_type=jnp.float32)
    y = y + b.reshape(1, Cout, 1, 1).astype(jnp.float32)
    # PixelShuffle (torch semantics).
    y = y.reshape(N, Cpost, r, r, H, W)
    y = jnp.transpose(y, (0, 1, 4, 2, 5, 3)).reshape(N, Cpost, H * r, W * r)
    return jnp.where(y >= 0, y, alpha * y)


if __name__ == "__main__":
    # Small synthetic config: n_channels=4, kernel_size=3, scaling_factor=2.
    N, Cin, H, W = 2, 4, 16, 16
    K, r = 3, 2
    Cout = Cin * r * r

    key = jax.random.PRNGKey(0)
    kx, kw, kb = jax.random.split(key, 3)
    x = jax.random.normal(kx, (N, Cin, H, W), dtype=jnp.float32)
    conv_w = jax.random.normal(kw, (Cout, Cin, K, K), dtype=jnp.float32) * 0.1
    conv_b = jax.random.normal(kb, (Cout,), dtype=jnp.float32) * 0.1
    prelu_alpha = 0.25  # nn.PReLU() default init

    out = subpixel_conv_block(x, conv_w, conv_b, prelu_alpha, scaling_factor=r)
    out = jax.block_until_ready(out)

    ref = _reference(x, conv_w, conv_b, prelu_alpha, r)
    assert out.shape == (N, Cin, H * r, W * r), out.shape
    assert jnp.allclose(out, ref, atol=1e-2, rtol=1e-2), "mismatch vs reference"

    print("KERNEL_OK")
</pallas_src>

<mosaic_0001>
module attributes {stable_mosaic.version = 11 : i64} {
  func.func @kernel(%arg0: i32, %arg1: i32, %arg2: memref<1x18x18x4xbf16, #tpu.memory_space<vmem>>, %arg3: memref<36x16xbf16, #tpu.memory_space<vmem>>, %arg4: memref<1x16xf32, #tpu.memory_space<vmem>>, %arg5: memref<1xf32, #tpu.memory_space<smem>>, %arg6: memref<1x8x2x16x8xf32, #tpu.memory_space<vmem>>) attributes {dimension_semantics = [#tpu.dimension_semantics<parallel>, #tpu.dimension_semantics<parallel>], iteration_bounds = array<i64: 2, 2>, scalar_prefetch = 0 : i64, scratch_operands = 0 : i64, tpu.core_type = #tpu.core_type<tc>, window_params = [{transform_indices = @transform_0, window_bounds = array<i64: 1, 18, 18, 4>}, {pipeline_mode = #tpu.pipeline_mode<synchronous>, transform_indices = @transform_1, window_bounds = array<i64: 36, 16>}, {pipeline_mode = #tpu.pipeline_mode<synchronous>, transform_indices = @transform_2, window_bounds = array<i64: 1, 16>}, {transform_indices = @transform_3, window_bounds = array<i64: 1>}, {transform_indices = @transform_4, window_bounds = array<i64: 1, 8, 2, 16, 8>}]} {
    %c8_i32 = arith.constant 8 : i32
    %0 = arith.muli %arg1, %c8_i32 : i32
    %1 = tpu.assume_multiple %0, 8 : i32
    %c0_i32 = arith.constant 0 : i32
    %2 = arith.addi %1, %c0_i32 : i32
    %c0 = arith.constant 0 : index
    %3 = arith.index_cast %2 : i32 to index
    %c0_0 = arith.constant 0 : index
    %c0_1 = arith.constant 0 : index
    %4 = vector.load %arg2[%c0, %3, %c0_0, %c0_1] : memref<1x18x18x4xbf16, #tpu.memory_space<vmem>>, vector<1x8x16x4xbf16>
    %5 = vector.shape_cast %4 : vector<1x8x16x4xbf16> to vector<8x16x4xbf16>
    %6 = vector.shape_cast %5 : vector<8x16x4xbf16> to vector<128x4xbf16>
    %c0_i32_2 = arith.constant 0 : i32
    %7 = arith.addi %1, %c0_i32_2 : i32
    %c0_3 = arith.constant 0 : index
    %8 = arith.index_cast %7 : i32 to index
    %c1 = arith.constant 1 : index
    %c0_4 = arith.constant 0 : index
    %9 = vector.load %arg2[%c0_3, %8, %c1, %c0_4] : memref<1x18x18x4xbf16, #tpu.memory_space<vmem>>, vector<1x8x16x4xbf16>
    %10 = vector.shape_cast %9 : vector<1x8x16x4xbf16> to vector<8x16x4xbf16>
    %11 = vector.shape_cast %10 : vector<8x16x4xbf16> to vector<128x4xbf16>
    %c0_i32_5 = arith.constant 0 : i32
    %12 = arith.addi %1, %c0_i32_5 : i32
    %c0_6 = arith.constant 0 : index
    %13 = arith.index_cast %12 : i32 to index
    %c2 = arith.constant 2 : index
    %c0_7 = arith.constant 0 : index
    %14 = vector.load %arg2[%c0_6, %13, %c2, %c0_7] : memref<1x18x18x4xbf16, #tpu.memory_space<vmem>>, vector<1x8x16x4xbf16>
    %15 = vector.shape_cast %14 : vector<1x8x16x4xbf16> to vector<8x16x4xbf16>
    %16 = vector.shape_cast %15 : vector<8x16x4xbf16> to vector<128x4xbf16>
    %c1_i32 = arith.constant 1 : i32
    %17 = arith.addi %1, %c1_i32 : i32
    %c0_8 = arith.constant 0 : index
    %18 = arith.index_cast %17 : i32 to index
    %c0_9 = arith.constant 0 : index
    %c0_10 = arith.constant 0 : index
    %19 = vector.load %arg2[%c0_8, %18, %c0_9, %c0_10] : memref<1x18x18x4xbf16, #tpu.memory_space<vmem>>, vector<1x8x16x4xbf16>
    %20 = vector.shape_cast %19 : vector<1x8x16x4xbf16> to vector<8x16x4xbf16>
    %21 = vector.shape_cast %20 : vector<8x16x4xbf16> to vector<128x4xbf16>
    %c1_i32_11 = arith.constant 1 : i32
    %22 = arith.addi %1, %c1_i32_11 : i32
    %c0_12 = arith.constant 0 : index
    %23 = arith.index_cast %22 : i32 to index
    %c1_13 = arith.constant 1 : index
    %c0_14 = arith.constant 0 : index
    %24 = vector.load %arg2[%c0_12, %23, %c1_13, %c0_14] : memref<1x18x18x4xbf16, #tpu.memory_space<vmem>>, vector<1x8x16x4xbf16>
    %25 = vector.shape_cast %24 : vector<1x8x16x4xbf16> to vector<8x16x4xbf16>
    %26 = vector.shape_cast %25 : vector<8x16x4xbf16> to vector<128x4xbf16>
    %c1_i32_15 = arith.constant 1 : i32
    %27 = arith.addi %1, %c1_i32_15 : i32
    %c0_16 = arith.constant 0 : index
    %28 = arith.index_cast %27 : i32 to index
    %c2_17 = arith.constant 2 : index
    %c0_18 = arith.constant 0 : index
    %29 = vector.load %arg2[%c0_16, %28, %c2_17, %c0_18] : memref<1x18x18x4xbf16, #tpu.memory_space<vmem>>, vector<1x8x16x4xbf16>
    %30 = vector.shape_cast %29 : vector<1x8x16x4xbf16> to vector<8x16x4xbf16>
    %31 = vector.shape_cast %30 : vector<8x16x4xbf16> to vector<128x4xbf16>
    %c2_i32 = arith.constant 2 : i32
    %32 = arith.addi %1, %c2_i32 : i32
    %c0_19 = arith.constant 0 : index
    %33 = arith.index_cast %32 : i32 to index
    %c0_20 = arith.constant 0 : index
    %c0_21 = arith.constant 0 : index
    %34 = vector.load %arg2[%c0_19, %33, %c0_20, %c0_21] : memref<1x18x18x4xbf16, #tpu.memory_space<vmem>>, vector<1x8x16x4xbf16>
    %35 = vector.shape_cast %34 : vector<1x8x16x4xbf16> to vector<8x16x4xbf16>
    %36 = vector.shape_cast %35 : vector<8x16x4xbf16> to vector<128x4xbf16>
    %c2_i32_22 = arith.constant 2 : i32
    %37 = arith.addi %1, %c2_i32_22 : i32
    %c0_23 = arith.constant 0 : index
    %38 = arith.index_cast %37 : i32 to index
    %c1_24 = arith.constant 1 : index
    %c0_25 = arith.constant 0 : index
    %39 = vector.load %arg2[%c0_23, %38, %c1_24, %c0_25] : memref<1x18x18x4xbf16, #tpu.memory_space<vmem>>, vector<1x8x16x4xbf16>
    %40 = vector.shape_cast %39 : vector<1x8x16x4xbf16> to vector<8x16x4xbf16>
    %41 = vector.shape_cast %40 : vector<8x16x4xbf16> to vector<128x4xbf16>
    %c2_i32_26 = arith.constant 2 : i32
    %42 = arith.addi %1, %c2_i32_26 : i32
    %c0_27 = arith.constant 0 : index
    %43 = arith.index_cast %42 : i32 to index
    %c2_28 = arith.constant 2 : index
    %c0_29 = arith.constant 0 : index
    %44 = vector.load %arg2[%c0_27, %43, %c2_28, %c0_29] : memref<1x18x18x4xbf16, #tpu.memory_space<vmem>>, vector<1x8x16x4xbf16>
    %45 = vector.shape_cast %44 : vector<1x8x16x4xbf16> to vector<8x16x4xbf16>
    %46 = vector.shape_cast %45 : vector<8x16x4xbf16> to vector<128x4xbf16>
    %47 = tpu.concatenate %6, %11, %16, %21, %26, %31, %36, %41, %46 in 1 : vector<128x4xbf16>, vector<128x4xbf16>, vector<128x4xbf16>, vector<128x4xbf16>, vector<128x4xbf16>, vector<128x4xbf16>, vector<128x4xbf16>, vector<128x4xbf16>, vector<128x4xbf16> -> vector<128x36xbf16>
    %c0_30 = arith.constant 0 : index
    %c0_31 = arith.constant 0 : index
    %48 = vector.load %arg3[%c0_30, %c0_31] : memref<36x16xbf16, #tpu.memory_space<vmem>>, vector<36x16xbf16>
    %cst = arith.constant dense<0.000000e+00> : vector<128x16xf32>
    %49 = tpu.matmul %47, %48, %cst {dimension_numbers = #tpu.dot_dimension_numbers<[1], [0], [0], [1], [0, 0, 1, 1], [], []>} : vector<128x36xbf16>, vector<36x16xbf16>, vector<128x16xf32> -> vector<128x16xf32>
    %c0_32 = arith.constant 0 : index
    %c0_33 = arith.constant 0 : index
    %50 = vector.load %arg4[%c0_32, %c0_33] : memref<1x16xf32, #tpu.memory_space<vmem>>, vector<1x16xf32>
    %51 = vector.broadcast %50 : vector<1x16xf32> to vector<128x16xf32>
    %52 = arith.addf %49, %51 : vector<128x16xf32>
    %c0_34 = arith.constant 0 : index
    %53 = memref.load %arg5[%c0_34] : memref<1xf32, #tpu.memory_space<smem>>
    %cst_35 = arith.constant 0.000000e+00 : f32
    %54 = vector.broadcast %cst_35 : f32 to vector<128x16xf32>
    %55 = arith.cmpf oge, %52, %54 : vector<128x16xf32>
    %56 = vector.broadcast %53 : f32 to vector<128x16xf32>
    %57 = arith.mulf %56, %52 : vector<128x16xf32>
    %58 = arith.select %55, %52, %57 : vector<128x16xi1>, vector<128x16xf32>
    %59 = vector.extract_strided_slice %58 {offsets = [0, 0], sizes = [128, 8], strides = [1, 1]} : vector<128x16xf32> to vector<128x8xf32>
    %60 = vector.shape_cast %59 : vector<128x8xf32> to vector<8x16x8xf32>
    %c0_36 = arith.constant 0 : index
    %c0_37 = arith.constant 0 : index
    %c0_38 = arith.constant 0 : index
    %c0_39 = arith.constant 0 : index
    %c0_40 = arith.constant 0 : index
    %61 = vector.load %arg6[%c0_36, %c0_37, %c0_38, %c0_39, %c0_40] : memref<1x8x2x16x8xf32, #tpu.memory_space<vmem>>, vector<1x8x1x16x8xf32>
    %62 = vector.shape_cast %61 : vector<1x8x1x16x8xf32> to vector<8x16x8xf32>
    %63 = vector.shape_cast %60 : vector<8x16x8xf32> to vector<1x8x1x16x8xf32>
    tpu.vector_store %arg6[%c0_36, %c0_37, %c0_38, %c0_39, %c0_40], %63 {strides = array<i32>} : memref<1x8x2x16x8xf32, #tpu.memory_space<vmem>>, vector<1x8x1x16x8xf32>,
    %64 = vector.extract_strided_slice %58 {offsets = [0, 8], sizes = [128, 8], strides = [1, 1]} : vector<128x16xf32> to vector<128x8xf32>
    %65 = vector.shape_cast %64 : vector<128x8xf32> to vector<8x16x8xf32>
    %c0_41 = arith.constant 0 : index
    %c0_42 = arith.constant 0 : index
    %c1_43 = arith.constant 1 : index
    %c0_44 = arith.constant 0 : index
    %c0_45 = arith.constant 0 : index
    %66 = vector.load %arg6[%c0_41, %c0_42, %c1_43, %c0_44, %c0_45] : memref<1x8x2x16x8xf32, #tpu.memory_space<vmem>>, vector<1x8x1x16x8xf32>
    %67 = vector.shape_cast %66 : vector<1x8x1x16x8xf32> to vector<8x16x8xf32>
    %68 = vector.shape_cast %65 : vector<8x16x8xf32> to vector<1x8x1x16x8xf32>
    tpu.vector_store %arg6[%c0_41, %c0_42, %c1_43, %c0_44, %c0_45], %68 {strides = array<i32>} : memref<1x8x2x16x8xf32, #tpu.memory_space<vmem>>, vector<1x8x1x16x8xf32>,
    return
  }
  func.func @transform_0(%arg0: i32, %arg1: i32) -> (i32, i32, i32, i32) {
    %c0_i32 = arith.constant 0 : i32
    %c0_i32_0 = arith.constant 0 : i32
    %c0_i32_1 = arith.constant 0 : i32
    %c0_i32_2 = arith.constant 0 : i32
    return %arg0, %c0_i32, %c0_i32_0, %c0_i32_1 : i32, i32, i32, i32
  }
  func.func @transform_1(%arg0: i32, %arg1: i32) -> (i32, i32) {
    %c0_i32 = arith.constant 0 : i32
    %c0_i32_0 = arith.constant 0 : i32
    %c0_i32_1 = arith.constant 0 : i32
    return %c0_i32, %c0_i32_0 : i32, i32
  }
  func.func @transform_2(%arg0: i32, %arg1: i32) -> (i32, i32) {
    %c0_i32 = arith.constant 0 : i32
    %c0_i32_0 = arith.constant 0 : i32
    %c0_i32_1 = arith.constant 0 : i32
    return %c0_i32, %c0_i32_0 : i32, i32
  }
  func.func @transform_3(%arg0: i32, %arg1: i32) -> i32 {
    %c0_i32 = arith.constant 0 : i32
    %c0_i32_0 = arith.constant 0 : i32
    return %c0_i32 : i32
  }
  func.func @transform_4(%arg0: i32, %arg1: i32) -> (i32, i32, i32, i32, i32) {
    %c0_i32 = arith.constant 0 : i32
    %c0_i32_0 = arith.constant 0 : i32
    %c0_i32_1 = arith.constant 0 : i32
    %c0_i32_2 = arith.constant 0 : i32
    return %arg0, %arg1, %c0_i32, %c0_i32_0, %c0_i32_1 : i32, i32, i32, i32, i32
  }
}

</mosaic_0001>

<bundles_post_ra>
// kernel: tpu_custom_call.1
= control target key start
LH: loop header
LB: loop body
LE: loop exit
PB: predicated region body
PF: predicated region fallthrough
CT: control target
= control target key end

     0   :  { %s2474_s17 = smov 0   ;;  %s2476_s18 = smov 0   ;;  %s3480_s0 = inlined_call_operand.vmem [shape: bf16[2,18,18,4], index: 0, kind: input, shape index: {}]   ;;  %s3481_s1 = inlined_call_operand.vmem [shape: bf16[36,16], index: 1, kind: input, shape index: {}]   ;;  %s3482_s2 = inlined_call_operand.vmem [shape: f32[1,16], index: 2, kind: input, shape index: {}]   ;;  %s3483_s3 = inlined_call_operand.<no memory space> [shape: f32[1], index: 3, kind: input, shape index: {}]   ;;  %s3484_s4 = inlined_call_operand.vmem [shape: f32[2,16,2,16,8], index: 4, kind: output, shape index: {}]  }
   0x1   :  { %9 = sst [smem:[#allocation2]] %s3483_s3  ;;  %s2478_s19 = smov 0  }
   0x2   :  { %s2480_s20 = smov 0   ;;  %s2482_s21 = smov 0  }
   0x3 LB: > { %s24_s3 = sadd.s32 1, %s2427_s19  ;;  %s27_s22 = sadd.s32 1, %s2431_s20  ;;  %s2435_s21 = sphi %s2482_s21, %s15_s21   ;;  %s2431_s20 = sphi %s2480_s20, %s3492_s20   ;;  %s2427_s19 = sphi %s2478_s19, %s3491_s19   ;;  %s2423_s18 = sphi %s2476_s18, %s3490_s18   ;;  %s2419_s17 = sphi %s2474_s17, %s3489_s17  }
   0x4   : > { %p25_p0 = scmp.ge.s32.totalorder %s24_s3, 2  ;;  %p2063_p1 = scmp.ge.s32.totalorder %s2435_s21, 1 }
   0x5   : > { %p177_p2 = scmp.lt.s32.totalorder %s2435_s21, 5 }
   0x6   : > { %s3494_s3 = smov (%p25_p0, %s24_s3), 0  ;;  %s3496_s22 = smov (!%p25_p0, %s27_s22), %s2431_s20 }
   0x7   : > { %p178_p3 = pnand %p2063_p1, %p177_p2  ;;  %p29_p4 = scmp.ge.s32.totalorder %s3496_s22, 2 }
   0x8   : > { %p208_p5 = scmp.lt.s32.totalorder (!%p178_p3), %s2423_s18, 1  ;;  %s2266_s23 = smul.u32 (!%p178_p3), 96, %s2419_s17 }
   0x9   : > { %s3498_s22 = smov (%p29_p4, %s3496_s22), 0  ;;  %181 = sbr.rel (%p178_p3) target bundleno = 620 (0x26c), region = 36 }
   0xa   : > { %s2437_s29 = smov (!%p178_p3), 12   ;;  %s2438_s30 = smov (!%p178_p3), 8  }
   0xb   : > { %s2439_s5 = smov (!%p178_p3), 4   ;;  %s2440_s6 = smov (!%p178_p3), 16  }
   0xc   : > { %s2441_s7 = smov (!%p178_p3), 20   ;;  %s2442_s8 = smov (!%p178_p3), 24  }
   0xd   : > { %s2443_s9 = smov (!%p178_p3), 28   ;;  %s2444_s10 = smov (!%p178_p3), 32  }
   0xe   : > { %s3500_s18 = smov (!%p208_p5, %s2423_s18), 1  ;;  %vm480_vm0 = vcmask 1042432   ;;  %vm481_vm1 = vcmask 1046532   ;;  %vm253_vm3 = vsmask.f32 3328  ;;  %vm1711_vm6 = vcmask 1041408  }
   0xf   : > { %s2308_s24 = smul.u32 216, %s3500_s18  ;;  %vm2561_vm2 = vmor %vm480_vm0, %vm481_vm1  ;;  %vm254_vm4 = vsmask.f32 7440  ;;  %v2382_v39 = vld [vmem:[%s3481_s1] sm:$0xff]   ;;  %vm1523_vm7 = vcmask 31744   ;;  %vm1548_vm8 = vcmask 64512  }
  0x10   : > { %vm2627_vm5 = vmor %vm253_vm3, %vm254_vm4  ;;  %vm1565_vm9 = vcmask 97280   ;;  %vm1582_vm10 = vcmask 130048   ;;  %vm1599_vm11 = vcmask 162816   ;;  %vm1616_vm12 = vcmask 195584   ;;  %s2067_s26 = sshll.u32 %s3500_s18, 6 }
  0x11   : > { %s212_s27 = scalar_lea.vmem %s3480_s0, %s2308_s24  ;;  %vm1633_vm13 = vcmask 228352   ;;  %vm1650_vm14 = vcmask 261120   ;;  %vm1694_vm15 = vcmask 293888   ;;  %s1812_s24 = sld [smem:[#allocation2]] }
  0x12   : > { %s2513_s28 = scalar_lea.vmem %s212_s27, %s2266_s23  ;;  %s2065_s23 = sshll.u32 %s2419_s17, 3 }
  0x13   : > { %v2090_v0 = vld [vmem:[%s2513_s28 + $0x3c] sm:$0xf]  ;;  %v2517_v1 = vld [vmem:[%s2513_s28 + $0x40] sm:$0xf]  ;;  %v2082_v2 = vld [vmem:[%s2513_s28 + $0xc] sm:$0xf] }
  0x14   : > { %v673_v3 = vshll.u32 %v2517_v1, 16  ;;  %v677_v4 = vshrl.u32 %v2517_v1, 16  ;;  %v2192_v5 = vcombine.low %v2090_v0, %v2517_v1  ;;  %v664_v6 = vshrl.u32 %v2090_v0, 16  ;;  %v2524_v7 = vld [vmem:[%s2513_s28 + $0x10] sm:$0xf]  ;;  %p216_p6 = scmp.lt.s32.totalorder %s2065_s23, 15 }
  0x15   : > { %v667_v8 = vshll.u32 %v2090_v0, 16  ;;  %v577_v9 = vshll.u32 %v2524_v7, 16  ;;  %v581_v10 = vshrl.u32 %v2524_v7, 16  ;;  %v2188_v11 = vcombine.low %v2082_v2, %v2524_v7  ;;  %v2092_v12 = vld [vmem:[%s2513_s28 + $0x48] sm:$0xf] }
  0x16   : > { %v2530_v13 = vrot.slane %v677_v4, 4  ;;  %1307 = vrot.lane.b32.xlu1 %v2192_v5, %s2437_s29  ;;  %v666_v14 = vrot.slane %v664_v6, 4  ;;  %v568_v15 = vshrl.u32 %v2082_v2, 16  ;;  %v571_v16 = vshll.u32 %v2082_v2, 16  ;;  %v2534_v17 = vld [vmem:[%s2513_s28 + $0x4c] sm:$0xf] }
  0x17   : > { %v669_v18 = vrot.slane %v667_v8, 5  ;;  %v2536_v19 = vrot.slane %v581_v10, 4  ;;  %1299 = vrot.lane.b32.xlu0 %v2188_v11, %s2437_s29  ;;  %v688_v20 = vshrl.u32 %v2092_v12, 16  ;;  %v691_v21 = vshll.u32 %v2092_v12, 16  ;;  %v2084_v22 = vld [vmem:[%s2513_s28 + $0x18] sm:$0xf] }
  0x18   : > { %v570_v23 = vrot.slane %v568_v15, 4  ;;  %v573_v24 = vrot.slane %v571_v16, 5  ;;  %v701_v25 = vshrl.u32 %v2534_v17, 16  ;;  %v2193_v26 = vcombine.low %v2092_v12, %v2534_v17  ;;  %v2543_v27 = vld [vmem:[%s2513_s28 + $0x1c] sm:$0xf]  ;;  %s3502_s23 = smov (!%p216_p6, %s2065_s23), 15 }
  0x19   : > { %v670_v28 = vor.u32 %v669_v18, %v666_v14  ;;  %v2545_v29 = vrot.slane %v688_v20, 4  ;;  %v2547_v30 = vrot.slane %v691_v21, 5  ;;  %v592_v31 = vshrl.u32 %v2084_v22, 16  ;;  %v2550_v32 = vld [vmem:[%s2513_s28 + $0x34] sm:$0xf]  ;;  %s2066_s25 = sshll.u32 %s3502_s23, 2 }
  0x1a   : > { %v574_v33 = vor.u32 %v573_v24, %v570_v23  ;;  %1309 = vrot.lane.b32.xlu1 %v2193_v26, %s2437_s29  ;;  %v595_v34 = vshll.u32 %v2084_v22, 16  ;;  %v605_v35 = vshrl.u32 %v2543_v27, 16  ;;  %v2189_v36 = vcombine.low %v2084_v22, %v2543_v27  ;;  %v2556_v37 = vld [vmem:[%s2513_s28 + $0x38] sm:$0x1]  ;;  %v452_v38 = vld [vmem:[%s2513_s28 + $0x30] sm:$0xe]  ;;  %s220_s27 = sadd.s32 %s2067_s26, %s2066_s25 }
  0x1b   : > { %v2565_v40 = vrot.slane %v670_v28, 4  ;;  %v2567_v41 = vrot.slane %v592_v31, 4  ;;  %v2076_v42 = vrot.slane %v452_v38, 9  ;;  %v513_v43 = vrot.slane %v2550_v32, 5  ;;  %v2571_v44 = vld [vmem:[%s2513_s28 + $0x4] sm:$0xf] }
  0x1c   : > { %v2573_v45 = vrot.slane %v574_v33, 4  ;;  %v2575_v46 = vrot.slane %v595_v34, 5  ;;  %1301 = vrot.lane.b32.xlu0 %v2189_v36, %s2437_s29  ;;  %v516_v47 = vrot.slane %v2556_v37, 5  ;;  %v2580_v48 = vld [vmem:[%s2513_s28 + $0x8] sm:$0x1]  ;;  %v485_v49 = vrot.slane %v2571_v44, 5 }
  0x1d   : > { %v514_v50 = vsel %vm2561_vm2, %v2076_v42, %v513_v43  ;;  %v515_v51 = vrot.slane %v513_v43, 4  ;;  %v448_v52 = vld [vmem:[%s2513_s28] sm:$0xe]  ;;  %v488_v53 = vrot.slane %v2580_v48, 5  ;;  %v2591_v57 = vld [vmem:[%s2513_s28 + $0x44] sm:$0x1]  ;;  %v694_v59 = vor.u32 %v2547_v30, %v2545_v29 }
  0x1e   : > { %v2588_v54 = vld [vmem:[%s2513_s28 + $0x40] sm:$0xf]  ;;  %v2072_v55 = vrot.slane %v448_v52, 9  ;;  %v487_v56 = vrot.slane %v485_v49, 4  ;;  %v453_v58 = vld [vmem:[%s2513_s28 + $0x3c] sm:$0xe]  ;;  %v598_v60 = vor.u32 %v2575_v46, %v2567_v41 }
  0x1f   : > { %v517_v61 = vsel %vm2561_vm2, %v515_v51, %v516_v47  ;;  %v2077_v62 = vrot.slane %v453_v58, 9  ;;  %v520_v63 = vrot.slane %v2588_v54, 5  ;;  %v523_v0 = vrot.slane %v2591_v57, 5  ;;  %v232_v2 = vld [vmem:[%s2513_s28 + $0x10] sm:$0xf] }
  0x20   : > { %v2184_v4 = vcombine.low %v514_v50, %v517_v61  ;;  %v486_v5 = vsel %vm2561_vm2, %v2072_v55, %v485_v49  ;;  %v489_v6 = vsel %vm2561_vm2, %v487_v56, %v488_v53  ;;  %v246_v8 = vld [vmem:[%s2513_s28 + $0x14] sm:$0x1]  ;;  %v449_v10 = vld [vmem:[%s2513_s28 + $0xc] sm:$0xe]  ;;  %v492_v11 = vrot.slane %v232_v2, 5 }
  0x21   : > { %v2180_v12 = vcombine.low %v486_v5, %v489_v6  ;;  %v521_v14 = vsel %vm2561_vm2, %v2077_v62, %v520_v63  ;;  %v522_v15 = vrot.slane %v520_v63, 4  ;;  %v2073_v16 = vrot.slane %v449_v10, 9  ;;  %v231_v18 = vld [vmem:[%s2513_s28 + $0xc] sm:$0xf]  ;;  %v229_v33 = vld [vmem:[%s2513_s28] sm:$0xf] }
  0x22   : > { %1259 = vrot.lane.b32.xlu1 %v2184_v4, %s2438_s30  ;;  %v494_v20 = vrot.slane %v492_v11, 4  ;;  %v495_v21 = vrot.slane %v246_v8, 5  ;;  %v281_v22 = vshrl.u32 %v231_v18, 16  ;;  %v284_v23 = vshll.u32 %v231_v18, 16  ;;  %v239_v56 = vld [vmem:[%s2513_s28 + $0x3c] sm:$0xf] }
  0x23   : > { %1251 = vrot.lane.b32.xlu0 %v2180_v12, %s2438_s30  ;;  %v524_v24 = vsel %vm2561_vm2, %v522_v15, %v523_v0  ;;  %v493_v26 = vsel %vm2561_vm2, %v2073_v16, %v492_v11  ;;  %v290_v28 = vshll.u32 %v232_v2, 16  ;;  %v294_v31 = vshrl.u32 %v232_v2, 16 }
  0x24   : > { %v2185_v34 = vcombine.low %v521_v14, %v524_v24  ;;  %v496_v36 = vsel %vm2561_vm2, %v494_v20, %v495_v21  ;;  %v283_v38 = vrot.slane %v281_v22, 4  ;;  %v286_v42 = vrot.slane %v284_v23, 5  ;;  %v237_v20 = vld [vmem:[%s2513_s28 + $0x30] sm:$0xf] }
  0x25   : > { %v2181_v43 = vcombine.low %v493_v26, %v496_v36  ;;  %v292_v47 = vrot.slane %v290_v28, 5  ;;  %v296_v49 = vrot.slane %v294_v31, 4  ;;  %v300_v50 = vshll.u32 %v246_v8, 16 }
  0x26   : > { %1261 = vrot.lane.b32.xlu1 %v2185_v34, %s2438_s30  ;;  %v287_v51 = vor.u32 %v286_v42, %v283_v38  ;;  %v257_v52 = vshrl.u32 %v229_v33, 16  ;;  %v260_v53 = vshll.u32 %v229_v33, 16  ;;  %v266_v55 = vshll.u32 %v2571_v44, 16 }
  0x27   : > { %1253 = vrot.lane.b32.xlu0 %v2181_v43, %s2438_s30  ;;  %v297_v61 = vor.u32 %v296_v49, %v292_v47  ;;  %v302_v62 = vrot.slane %v300_v50, 5  ;;  %v270_v63 = vshrl.u32 %v2571_v44, 16  ;;  %v276_v0 = vshll.u32 %v2580_v48, 16 }
  0x28   : > { %v288_v2 = vrot.slane %v287_v51, 4  ;;  %v259_v4 = vrot.slane %v257_v52, 4  ;;  %v262_v5 = vrot.slane %v260_v53, 5  ;;  %v268_v6 = vrot.slane %v266_v55, 5  ;;  %v2648_v52 = vld [vmem:[%s2513_s28 + $0x44] sm:$0x1] }
  0x29   : > { %v298_v8 = vrot.slane %v297_v61, 4  ;;  %v272_v10 = vrot.slane %v270_v63, 4  ;;  %v278_v11 = vrot.slane %v276_v0, 5  ;;  %v377_v12 = vshrl.u32 %v239_v56, 16 }
  0x2a   : > { %v293_v14 = vsel %vm2627_vm5, %v288_v2, %v292_v47  ;;  %v263_v15 = vor.u32 %v262_v5, %v259_v4  ;;  %v380_v16 = vshll.u32 %v239_v56, 16  ;;  %v386_v18 = vshll.u32 %v2588_v54, 16 }
  0x2b   : > { %v303_v44 = vsel %vm2627_vm5, %v298_v8, %v302_v62  ;;  %v273_v48 = vor.u32 %v272_v10, %v268_v6  ;;  %v379_v21 = vrot.slane %v377_v12, 4  ;;  %v390_v22 = vshrl.u32 %v2588_v54, 16 }
  0x2c   : > { %v2173_v23 = vcombine.low %v293_v14, %v303_v44  ;;  %v264_v24 = vrot.slane %v263_v15, 4  ;;  %v382_v26 = vrot.slane %v380_v16, 5  ;;  %v388_v28 = vrot.slane %v386_v18, 5  ;;  %v2675_v44 = vld [vmem:[%s2513_s28 + $0x50] sm:$0x1] }
  0x2d   : > { %v274_v31 = vrot.slane %v273_v48, 4  ;;  %v392_v33 = vrot.slane %v390_v22, 4  ;;  %v396_v34 = vshll.u32 %v2591_v57, 16  ;;  %v353_v36 = vshrl.u32 %v237_v20, 16 }
  0x2e   : > { %1213 = vrot.lane.b32.xlu1 %v2173_v23, %s2439_s5  ;;  %v269_v38 = vsel %vm2627_vm5, %v264_v24, %v268_v6  ;;  %v383_v42 = vor.u32 %v382_v26, %v379_v21  ;;  %v356_v43 = vshll.u32 %v237_v20, 16  ;;  %v362_v54 = vshll.u32 %v2550_v32, 16  ;;  %v2659_v6 = vld [vmem:[%s2513_s28 + $0x14] sm:$0x1] }
  0x2f   : > { %v279_v47 = vsel %vm2627_vm5, %v274_v31, %v278_v11  ;;  %v393_v49 = vor.u32 %v392_v33, %v388_v28  ;;  %v398_v50 = vrot.slane %v396_v34, 5  ;;  %v355_v51 = vrot.slane %v353_v36, 4  ;;  %v2690_v31 = vld [vmem:[%s2513_s28 + $0x20] sm:$0x1]  ;;  %v2110_v34 = vld [vmem:[%s2513_s28 + $0x3c] sm:$0xe] }
  0x30   : > { %v2172_v57 = vcombine.low %v269_v38, %v279_v47  ;;  %v384_v53 = vrot.slane %v383_v42, 4  ;;  %v358_v55 = vrot.slane %v356_v43, 5  ;;  %v364_v56 = vrot.slane %v362_v54, 5  ;;  %v2106_v54 = vld [vmem:[%s2513_s28 + $0xc] sm:$0xe] }
  0x31   : > { %v394_v61 = vrot.slane %v393_v49, 4  ;;  %v366_v62 = vshrl.u32 %v2550_v32, 16  ;;  %v372_v63 = vshll.u32 %v2556_v37, 16  ;;  %v675_v0 = vrot.slane %v673_v3, 5 }
  0x32   : > { %1211 = vrot.lane.b32.xlu0 %v2172_v57, %s2439_s5  ;;  %v389_v2 = vsel %vm2627_vm5, %v384_v53, %v388_v28  ;;  %v359_v4 = vor.u32 %v358_v55, %v355_v51  ;;  %v683_v5 = vshll.u32 %v2648_v52, 16  ;;  %v579_v8 = vrot.slane %v577_v9, 5  ;;  %v2111_v53 = vld [vmem:[%s2513_s28 + $0x48] sm:$0xe] }
  0x33   : > { %v399_v32 = vsel %vm2627_vm5, %v394_v61, %v398_v50  ;;  %v368_v37 = vrot.slane %v366_v62, 4  ;;  %v374_v10 = vrot.slane %v372_v63, 5  ;;  %v676_v3 = vsel %vm2627_vm5, %v2565_v40, %v675_v0 }
  0x34   : > { %v2177_v11 = vcombine.low %v389_v2, %v399_v32  ;;  %v360_v12 = vrot.slane %v359_v4, 4  ;;  %v680_v14 = vor.u32 %v2530_v13, %v675_v0  ;;  %v685_v15 = vrot.slane %v683_v5, 5 }
  0x35   : > { %v369_v16 = vor.u32 %v368_v37, %v364_v56  ;;  %v580_v18 = vsel %vm2627_vm5, %v2573_v45, %v579_v8  ;;  %v584_v9 = vor.u32 %v2536_v19, %v579_v8  ;;  %v587_v20 = vshll.u32 %v2659_v6, 16 }
  0x36   : > { %1221 = vrot.lane.b32.xlu1 %v2177_v11, %s2439_s5  ;;  %v365_v40 = vsel %vm2627_vm5, %v360_v12, %v364_v56  ;;  %v681_v48 = vrot.slane %v680_v14, 4  ;;  %v695_v13 = vrot.slane %v694_v59, 4  ;;  %v697_v45 = vshll.u32 %v2534_v17, 16 }
  0x37   : > { %v370_v21 = vrot.slane %v369_v16, 4  ;;  %v585_v22 = vrot.slane %v584_v9, 4  ;;  %v589_v19 = vrot.slane %v587_v20, 5  ;;  %v703_v23 = vrot.slane %v701_v25, 4  ;;  %v2742_v20 = vld [vmem:[%s2513_s28 + $0x18] sm:$0xf] }
  0x38   : > { %v686_v24 = vsel %vm2627_vm5, %v681_v48, %v685_v15  ;;  %v699_v26 = vrot.slane %v697_v45, 5  ;;  %v707_v28 = vshll.u32 %v2675_v44, 16  ;;  %v599_v29 = vrot.slane %v598_v60, 4  ;;  %v2735_v15 = vld [vmem:[%s2513_s28 + $0x4c] sm:$0xf] }
  0x39   : > { %v375_v30 = vsel %vm2627_vm5, %v370_v21, %v374_v10  ;;  %v2200_v59 = vcombine.low %v676_v3, %v686_v24  ;;  %v590_v33 = vsel %vm2627_vm5, %v585_v22, %v589_v19  ;;  %v601_v25 = vshll.u32 %v2543_v27, 16  ;;  %v2748_v45 = vld [vmem:[%s2513_s28 + $0x1c] sm:$0xf] }
  0x3a   : > { %v2176_v36 = vcombine.low %v365_v40, %v375_v30  ;;  %v2196_v38 = vcombine.low %v580_v18, %v590_v33  ;;  %v700_v42 = vsel %vm2627_vm5, %v695_v13, %v699_v26  ;;  %v704_v43 = vor.u32 %v703_v23, %v699_v26  ;;  %v2758_v23 = vld [vmem:[%s2513_s28 + $0x54] sm:$0xf] }
  0x3b   : > { %1347 = vrot.lane.b32.xlu1 %v2200_v59, %s2440_s6  ;;  %v709_v41 = vrot.slane %v707_v28, 5  ;;  %v603_v46 = vrot.slane %v601_v25, 5  ;;  %v607_v60 = vrot.slane %v605_v35, 4  ;;  %v611_v47 = vshll.u32 %v2690_v31, 16 }
  0x3c   : > { %1219 = vrot.lane.b32.xlu0 %v2176_v36, %s2439_s5  ;;  %v705_v49 = vrot.slane %v704_v43, 4  ;;  %v2118_v50 = vrot.slane %v2110_v34, 9  ;;  %v821_v51 = vrot.slane %v2517_v1, 5  ;;  %v824_v57 = vrot.slane %v2648_v52, 5  ;;  %v2107_v1 = vld [vmem:[%s2513_s28 + $0x18] sm:$0xe] }
  0x3d   : > { %v604_v55 = vsel %vm2627_vm5, %v599_v29, %v603_v46  ;;  %v608_v56 = vor.u32 %v607_v60, %v603_v46  ;;  %v613_v61 = vrot.slane %v611_v47, 5  ;;  %v2114_v62 = vrot.slane %v2106_v54, 9  ;;  %v2764_v29 = vld [vmem:[%s2513_s28 + $0x58] sm:$0xf]  ;;  %v2770_v34 = vld [vmem:[%s2513_s28 + $0x24] sm:$0xf] }
  0x3e   : > { %v710_v35 = vsel %vm2627_vm5, %v705_v49, %v709_v41  ;;  %v822_v63 = vsel %vm2561_vm2, %v2118_v50, %v821_v51  ;;  %v823_v0 = vrot.slane %v821_v51, 4  ;;  %v793_v2 = vrot.slane %v2524_v7, 5  ;;  %v2728_v7 = vld [vmem:[%s2513_s28 + $0x48] sm:$0xf]  ;;  %v2784_v49 = vld [vmem:[%s2513_s28 + $0x50] sm:$0x1] }
  0x3f   : > { %v2201_v52 = vcombine.low %v700_v42, %v710_v35  ;;  %v609_v4 = vrot.slane %v608_v56, 4  ;;  %v796_v5 = vrot.slane %v2659_v6, 5  ;;  %v2119_v8 = vrot.slane %v2111_v53, 9  ;;  %v2779_v54 = vld [vmem:[%s2513_s28 + $0x28] sm:$0xf] }
  0x40   : > { %1339 = vrot.lane.b32.xlu0 %v2196_v38, %s2440_s6  ;;  %v825_v32 = vsel %vm2561_vm2, %v823_v0, %v824_v57  ;;  %v794_v37 = vsel %vm2561_vm2, %v2114_v62, %v793_v2  ;;  %v795_v10 = vrot.slane %v793_v2, 4  ;;  %v828_v3 = vrot.slane %v2534_v17, 5  ;;  %v2795_v35 = vld [vmem:[%s2513_s28 + $0x20] sm:$0x1] }
  0x41   : > { %1349 = vrot.lane.b32.xlu1 %v2201_v52, %s2440_s6  ;;  %v614_v6 = vsel %vm2627_vm5, %v609_v4, %v613_v61  ;;  %v2208_v11 = vcombine.low %v822_v63, %v825_v32  ;;  %v831_v12 = vrot.slane %v2675_v44, 5  ;;  %v2115_v14 = vrot.slane %v2107_v1, 9 }
  0x42   : > { %v2197_v16 = vcombine.low %v604_v55, %v614_v6  ;;  %v797_v18 = vsel %vm2561_vm2, %v795_v10, %v796_v5  ;;  %v829_v17 = vsel %vm2561_vm2, %v2119_v8, %v828_v3  ;;  %v830_v9 = vrot.slane %v828_v3, 4 }
  0x43   : > { %v2204_v40 = vcombine.low %v794_v37, %v797_v18  ;;  %v800_v48 = vrot.slane %v2543_v27, 5  ;;  %v803_v44 = vrot.slane %v2690_v31, 5  ;;  %v972_v13 = vshrl.u32 %v2728_v7, 16 }
  0x44   : > { %1341 = vrot.lane.b32.xlu0 %v2197_v16, %s2440_s6  ;;  %v832_v21 = vsel %vm2561_vm2, %v830_v9, %v831_v12  ;;  %v975_v22 = vshll.u32 %v2728_v7, 16  ;;  %v985_v19 = vshrl.u32 %v2735_v15, 16  ;;  %v2216_v27 = vcombine.low %v2728_v7, %v2735_v15 }
  0x45   : > { %1387 = vrot.lane.b32.xlu1 %v2208_v11, %s2441_s7  ;;  %v2209_v24 = vcombine.low %v829_v17, %v832_v21  ;;  %v801_v26 = vsel %vm2561_vm2, %v2115_v14, %v800_v48  ;;  %v802_v28 = vrot.slane %v800_v48, 4  ;;  %v974_v31 = vrot.slane %v972_v13, 4  ;;  %v2804_v11 = vld [vmem:[%s2513_s28 + $0x5c] sm:$0x1] }
  0x46   : > { %v977_v30 = vrot.slane %v975_v22, 5  ;;  %v876_v59 = vshrl.u32 %v2742_v20, 16  ;;  %v879_v33 = vshll.u32 %v2742_v20, 16  ;;  %v889_v25 = vshrl.u32 %v2748_v45, 16  ;;  %v2815_v22 = vld [vmem:[%s2513_s28 + $0x2c] sm:$0x1] }
  0x47   : > { %v804_v36 = vsel %vm2561_vm2, %v802_v28, %v803_v44  ;;  %v2212_v38 = vcombine.low %v2742_v20, %v2748_v45  ;;  %v996_v42 = vshrl.u32 %v2758_v23, 16  ;;  %v999_v43 = vshll.u32 %v2758_v23, 16 }
  0x48   : > { %1379 = vrot.lane.b32.xlu0 %v2204_v40, %s2441_s7  ;;  %v2205_v41 = vcombine.low %v801_v26, %v804_v36  ;;  %v878_v46 = vrot.slane %v876_v59, 4  ;;  %v881_v60 = vrot.slane %v879_v33, 5  ;;  %v1009_v47 = vshrl.u32 %v2764_v29, 16 }
  0x49   : > { %1389 = vrot.lane.b32.xlu1 %v2209_v24, %s2441_s7  ;;  %v998_v50 = vrot.slane %v996_v42, 4  ;;  %v1001_v51 = vrot.slane %v999_v43, 5  ;;  %v2217_v57 = vcombine.low %v2758_v23, %v2764_v29  ;;  %v900_v53 = vshrl.u32 %v2770_v34, 16  ;;  %v2148_v43 = vld [vmem:[%s2513_s28 + $0x18] sm:$0xe] }
  0x4a   : > { %v903_v55 = vshll.u32 %v2770_v34, 16  ;;  %v913_v56 = vshrl.u32 %v2779_v54, 16  ;;  %v2213_v61 = vcombine.low %v2770_v34, %v2779_v54  ;;  %v978_v62 = vor.u32 %v977_v30, %v974_v31  ;;  %v2152_v31 = vld [vmem:[%s2513_s28 + $0x48] sm:$0xe] }
  0x4b   : > { %v902_v63 = vrot.slane %v900_v53, 4  ;;  %v981_v0 = vshll.u32 %v2735_v15, 16  ;;  %v987_v2 = vrot.slane %v985_v19, 4  ;;  %v991_v1 = vshll.u32 %v2784_v49, 16 }
  0x4c   : > { %1381 = vrot.lane.b32.xlu0 %v2205_v41, %s2441_s7  ;;  %v905_v52 = vrot.slane %v903_v55, 5  ;;  %v979_v4 = vrot.slane %v978_v62, 4  ;;  %v882_v5 = vor.u32 %v881_v60, %v878_v46  ;;  %v885_v8 = vshll.u32 %v2748_v45, 16 }
  0x4d   : > { %1435 = vrot.lane.b32.xlu1 %v2216_v27, %s2442_s8  ;;  %v983_v32 = vrot.slane %v981_v0, 5  ;;  %v993_v37 = vrot.slane %v991_v1, 5  ;;  %v891_v10 = vrot.slane %v889_v25, 4  ;;  %v895_v3 = vshll.u32 %v2795_v35, 16  ;;  %v2838_v0 = vld [vmem:[%s2513_s28 + $0x4c] sm:$0xf] }
  0x4e   : > { %v883_v7 = vrot.slane %v882_v5, 4  ;;  %v887_v6 = vrot.slane %v885_v8, 5  ;;  %v1002_v12 = vor.u32 %v1001_v51, %v998_v50  ;;  %v1005_v14 = vshll.u32 %v2764_v29, 16  ;;  %v241_v50 = vld [vmem:[%s2513_s28 + $0x48] sm:$0xf] }
  0x4f   : > { %v984_v16 = vsel %vm2627_vm5, %v979_v4, %v983_v32  ;;  %v988_v18 = vor.u32 %v987_v2, %v983_v32  ;;  %v897_v17 = vrot.slane %v895_v3, 5  ;;  %v1011_v9 = vrot.slane %v1009_v47, 4  ;;  %v2849_v5 = vld [vmem:[%s2513_s28 + $0x50] sm:$0x1]  ;;  %v233_v32 = vld [vmem:[%s2513_s28 + $0x18] sm:$0xf] }
  0x50   : > { %1427 = vrot.lane.b32.xlu0 %v2212_v38, %s2442_s8  ;;  %v888_v20 = vsel %vm2627_vm5, %v883_v7, %v887_v6  ;;  %v892_v40 = vor.u32 %v891_v10, %v887_v6  ;;  %v1003_v48 = vrot.slane %v1002_v12, 4  ;;  %v1007_v44 = vrot.slane %v1005_v14, 5  ;;  %v2857_v7 = vld [vmem:[%s2513_s28 + $0x1c] sm:$0xf] }
  0x51   : > { %1437 = vrot.lane.b32.xlu1 %v2217_v57, %s2442_s8  ;;  %v989_v13 = vrot.slane %v988_v18, 4  ;;  %v1015_v21 = vshll.u32 %v2804_v11, 16  ;;  %v906_v19 = vor.u32 %v905_v52, %v902_v63  ;;  %v909_v27 = vshll.u32 %v2779_v54, 16  ;;  %v2863_v18 = vld [vmem:[%s2513_s28 + $0x20] sm:$0x1] }
  0x52   : > { %v893_v23 = vrot.slane %v892_v40, 4  ;;  %v1008_v24 = vsel %vm2627_vm5, %v1003_v48, %v1007_v44  ;;  %v1012_v26 = vor.u32 %v1011_v9, %v1007_v44  ;;  %v915_v28 = vrot.slane %v913_v56, 4 }
  0x53   : > { %v994_v30 = vsel %vm2627_vm5, %v989_v13, %v993_v37  ;;  %v1017_v59 = vrot.slane %v1015_v21, 5  ;;  %v907_v33 = vrot.slane %v906_v19, 4  ;;  %v911_v25 = vrot.slane %v909_v27, 5  ;;  %v2153_v19 = vld [vmem:[%s2513_s28 + $0x54] sm:$0xe] }
  0x54   : > { %1429 = vrot.lane.b32.xlu0 %v2213_v61, %s2442_s8  ;;  %v2224_v34 = vcombine.low %v984_v16, %v994_v30  ;;  %v898_v36 = vsel %vm2627_vm5, %v893_v23, %v897_v17  ;;  %v1013_v38 = vrot.slane %v1012_v26, 4  ;;  %v919_v42 = vshll.u32 %v2815_v22, 16 }
  0x55   : > { %v2220_v41 = vcombine.low %v888_v20, %v898_v36  ;;  %v912_v46 = vsel %vm2627_vm5, %v907_v33, %v911_v25  ;;  %v916_v60 = vor.u32 %v915_v28, %v911_v25  ;;  %v2160_v47 = vrot.slane %v2152_v31, 9  ;;  %v2149_v33 = vld [vmem:[%s2513_s28 + $0x24] sm:$0xe] }
  0x56   : > { %1475 = vrot.lane.b32.xlu1 %v2224_v34, %s2443_s9  ;;  %v1018_v51 = vsel %vm2627_vm5, %v1013_v38, %v1017_v59  ;;  %v921_v57 = vrot.slane %v919_v42, 5  ;;  %v1129_v53 = vrot.slane %v2735_v15, 5  ;;  %v1132_v55 = vrot.slane %v2784_v49, 5 }
  0x57   : > { %v2225_v56 = vcombine.low %v1008_v24, %v1018_v51  ;;  %v917_v61 = vrot.slane %v916_v60, 4  ;;  %v2156_v62 = vrot.slane %v2148_v43, 9  ;;  %v1101_v63 = vrot.slane %v2748_v45, 5  ;;  %v2879_v60 = vld [vmem:[%s2513_s28 + $0x54] sm:$0xf] }
  0x58   : > { %1467 = vrot.lane.b32.xlu0 %v2220_v41, %s2443_s9  ;;  %v1130_v2 = vsel %vm2561_vm2, %v2160_v47, %v1129_v53  ;;  %v1131_v1 = vrot.slane %v1129_v53, 4  ;;  %v1104_v52 = vrot.slane %v2795_v35, 5  ;;  %v401_v15 = vshrl.u32 %v241_v50, 16 }
  0x59   : > { %v922_v49 = vsel %vm2627_vm5, %v917_v61, %v921_v57  ;;  %v1102_v4 = vsel %vm2561_vm2, %v2156_v62, %v1101_v63  ;;  %v1103_v45 = vrot.slane %v1101_v63, 4  ;;  %v404_v8 = vshll.u32 %v241_v50, 16  ;;  %v2888_v61 = vld [vmem:[%s2513_s28 + $0x58] sm:$0xf] }
  0x5a   : > { %1477 = vrot.lane.b32.xlu1 %v2225_v56, %s2443_s9  ;;  %v2221_v37 = vcombine.low %v912_v46, %v922_v49  ;;  %v1133_v10 = vsel %vm2561_vm2, %v1131_v1, %v1132_v55  ;;  %v403_v35 = vrot.slane %v401_v15, 4  ;;  %v410_v3 = vshll.u32 %v2838_v0, 16  ;;  %v2901_v49 = vld [vmem:[%s2513_s28 + $0x24] sm:$0xf] }
  0x5b   : > { %v2232_v6 = vcombine.low %v1130_v2, %v1133_v10  ;;  %v1105_v12 = vsel %vm2561_vm2, %v1103_v45, %v1104_v52  ;;  %v406_v14 = vrot.slane %v404_v8, 5  ;;  %v414_v16 = vshrl.u32 %v2838_v0, 16  ;;  %v2893_v2 = vld [vmem:[%s2513_s28 + $0x5c] sm:$0x1] }
  0x5c   : > { %1469 = vrot.lane.b32.xlu0 %v2221_v37, %s2443_s9  ;;  %v2228_v17 = vcombine.low %v1102_v4, %v1105_v12  ;;  %v412_v9 = vrot.slane %v410_v3, 5  ;;  %v420_v20 = vshll.u32 %v2849_v5, 16  ;;  %v305_v40 = vshrl.u32 %v233_v32, 16  ;;  %v2909_v37 = vld [vmem:[%s2513_s28 + $0x28] sm:$0xf] }
  0x5d   : > { %v407_v48 = vor.u32 %v406_v14, %v403_v35  ;;  %v416_v44 = vrot.slane %v414_v16, 4  ;;  %v308_v13 = vshll.u32 %v233_v32, 16  ;;  %v314_v21 = vshll.u32 %v2857_v7, 16  ;;  %v2916_v12 = vld [vmem:[%s2513_s28 + $0x2c] sm:$0x1] }
  0x5e   : > { %1515 = vrot.lane.b32.xlu1 %v2232_v6, %s2444_s10  ;;  %v422_v27 = vrot.slane %v420_v20, 5  ;;  %v307_v23 = vrot.slane %v305_v40, 4  ;;  %v318_v24 = vshrl.u32 %v2857_v7, 16  ;;  %v324_v26 = vshll.u32 %v2863_v18, 16  ;;  %v454_v20 = vld [vmem:[%s2513_s28 + $0x48] sm:$0xe] }
  0x5f   : > { %v408_v28 = vrot.slane %v407_v48, 4  ;;  %v417_v31 = vor.u32 %v416_v44, %v412_v9  ;;  %v310_v30 = vrot.slane %v308_v13, 5  ;;  %v316_v59 = vrot.slane %v314_v21, 5 }
  0x60   : > { %1507 = vrot.lane.b32.xlu0 %v2228_v17, %s2444_s10  ;;  %v320_v25 = vrot.slane %v318_v24, 4  ;;  %v326_v34 = vrot.slane %v324_v26, 5  ;;  %v2161_v36 = vrot.slane %v2153_v19, 9  ;;  %v1136_v38 = vrot.slane %v2764_v29, 5  ;;  %v450_v24 = vld [vmem:[%s2513_s28 + $0x18] sm:$0xe] }
  0x61   : > { %v413_v42 = vsel %vm2627_vm5, %v408_v28, %v412_v9  ;;  %v418_v43 = vrot.slane %v417_v31, 4  ;;  %v311_v41 = vor.u32 %v310_v30, %v307_v23  ;;  %v1139_v46 = vrot.slane %v2804_v11, 5 }
  0x62   : > { %v321_v47 = vor.u32 %v320_v25, %v316_v59  ;;  %v1137_v50 = vsel %vm2561_vm2, %v2161_v36, %v1136_v38  ;;  %v1138_v51 = vrot.slane %v1136_v38, 4  ;;  %v2157_v57 = vrot.slane %v2149_v33, 9 }
  0x63   : > { %v423_v29 = vsel %vm2627_vm5, %v418_v43, %v422_v27  ;;  %v312_v53 = vrot.slane %v311_v41, 4  ;;  %v1108_v55 = vrot.slane %v2779_v54, 5  ;;  %v1111_v56 = vrot.slane %v2815_v22, 5  ;;  %v455_v41 = vld [vmem:[%s2513_s28 + $0x54] sm:$0xe] }
  0x64   : > { %v2178_v11 = vcombine.low %v413_v42, %v423_v29  ;;  %v322_v62 = vrot.slane %v321_v47, 4  ;;  %v1140_v63 = vsel %vm2561_vm2, %v1138_v51, %v1139_v46  ;;  %v425_v1 = vshrl.u32 %v2879_v60, 16 }
  0x65   : > { %v317_v52 = vsel %vm2627_vm5, %v312_v53, %v316_v59  ;;  %v2233_v15 = vcombine.low %v1137_v50, %v1140_v63  ;;  %v1109_v54 = vsel %vm2561_vm2, %v2157_v57, %v1108_v55  ;;  %v1110_v22 = vrot.slane %v1108_v55, 4 }
  0x66   : > { %1223 = vrot.lane.b32.xlu1 %v2178_v11, %s2439_s5  ;;  %v327_v4 = vsel %vm2627_vm5, %v322_v62, %v326_v34  ;;  %v427_v45 = vrot.slane %v425_v1, 4  ;;  %v428_v8 = vshll.u32 %v2879_v60, 16  ;;  %v434_v32 = vshll.u32 %v2888_v61, 16 }
  0x67   : > { %v2174_v10 = vcombine.low %v317_v52, %v327_v4  ;;  %v1112_v35 = vsel %vm2561_vm2, %v1110_v22, %v1111_v56  ;;  %v438_v3 = vshrl.u32 %v2888_v61, 16  ;;  %v444_v6 = vshll.u32 %v2893_v2, 16 }
  0x68   : > { %v2229_v14 = vcombine.low %v1109_v54, %v1112_v35  ;;  %v430_v16 = vrot.slane %v428_v8, 5  ;;  %v436_v17 = vrot.slane %v434_v32, 5  ;;  %v329_v9 = vshrl.u32 %v2901_v49, 16 }
  0x69   : > { %1215 = vrot.lane.b32.xlu0 %v2174_v10, %s2439_s5  ;;  %v440_v40 = vrot.slane %v438_v3, 4  ;;  %v446_v48 = vrot.slane %v444_v6, 5  ;;  %v332_v44 = vshll.u32 %v2901_v49, 16  ;;  %v338_v13 = vshll.u32 %v2909_v37, 16  ;;  %v2962_v3 = vld [vmem:[%s2513_s28 + $0x24] sm:$0xf] }
  0x6a   : > { %1517 = vrot.lane.b32.xlu1 %v2233_v15, %s2444_s10  ;;  %v431_v21 = vor.u32 %v430_v16, %v427_v45  ;;  %v331_v19 = vrot.slane %v329_v9, 4  ;;  %v342_v27 = vshrl.u32 %v2909_v37, 16  ;;  %v348_v23 = vshll.u32 %v2916_v12, 16  ;;  %v2955_v45 = vld [vmem:[%s2513_s28 + $0x58] sm:$0xf] }
  0x6b   : > { %v441_v26 = vor.u32 %v440_v40, %v436_v17  ;;  %v334_v28 = vrot.slane %v332_v44, 5  ;;  %v340_v31 = vrot.slane %v338_v13, 5  ;;  %v2078_v30 = vrot.slane %v454_v20, 9  ;;  %v2973_v40 = vld [vmem:[%s2513_s28 + $0x28] sm:$0xf] }
  0x6c   : > { %v432_v59 = vrot.slane %v431_v21, 4  ;;  %v344_v33 = vrot.slane %v342_v27, 4  ;;  %v350_v25 = vrot.slane %v348_v23, 5  ;;  %v527_v34 = vrot.slane %v2838_v0, 5  ;;  %v2983_v27 = vld [vmem:[%s2513_s28 + $0x64] sm:$0xf] }
  0x6d   : > { %1509 = vrot.lane.b32.xlu0 %v2229_v14, %s2444_s10  ;;  %v442_v36 = vrot.slane %v441_v26, 4  ;;  %v335_v38 = vor.u32 %v334_v28, %v331_v19  ;;  %v530_v42 = vrot.slane %v2849_v5, 5  ;;  %v2074_v43 = vrot.slane %v450_v24, 9  ;;  %v451_v5 = vld [vmem:[%s2513_s28 + $0x24] sm:$0xe] }
  0x6e   : > { %v437_v46 = vsel %vm2627_vm5, %v432_v59, %v436_v17  ;;  %v345_v47 = vor.u32 %v344_v33, %v340_v31  ;;  %v528_v50 = vsel %vm2561_vm2, %v2078_v30, %v527_v34  ;;  %v529_v51 = vrot.slane %v527_v34, 4  ;;  %v2096_v19 = vld [vmem:[%s2513_s28 + $0x60] sm:$0xf]  ;;  %v2992_v30 = vld [vmem:[%s2513_s28 + $0x34] sm:$0xf] }
  0x6f   : > { %v447_v0 = vsel %vm2627_vm5, %v442_v36, %v446_v48  ;;  %v336_v57 = vrot.slane %v335_v38, 4  ;;  %v499_v29 = vrot.slane %v2857_v7, 5  ;;  %v502_v53 = vrot.slane %v2863_v18, 5  ;;  %v2947_v7 = vld [vmem:[%s2513_s28 + $0x54] sm:$0xf] }
  0x70   : > { %v2179_v55 = vcombine.low %v437_v46, %v447_v0  ;;  %v346_v56 = vrot.slane %v345_v47, 4  ;;  %v531_v11 = vsel %vm2561_vm2, %v529_v51, %v530_v42  ;;  %v2079_v62 = vrot.slane %v455_v41, 9  ;;  %v3005_v51 = vld [vmem:[%s2513_s28 + $0x5c] sm:$0x1] }
  0x71   : > { %v341_v63 = vsel %vm2627_vm5, %v336_v57, %v340_v31  ;;  %v2186_v1 = vcombine.low %v528_v50, %v531_v11  ;;  %v500_v52 = vsel %vm2561_vm2, %v2074_v43, %v499_v29  ;;  %v501_v15 = vrot.slane %v499_v29, 4  ;;  %v2989_v31 = vld [vmem:[%s2513_s28 + $0x30] sm:$0xf] }
  0x72   : > { %1225 = vrot.lane.b32.xlu1 %v2179_v55, %s2439_s5  ;;  %v351_v18 = vsel %vm2627_vm5, %v346_v56, %v350_v25  ;;  %v534_v54 = vrot.slane %v2888_v61, 5  ;;  %v537_v22 = vrot.slane %v2893_v2, 5  ;;  %v2075_v4 = vrot.slane %v451_v5, 9  ;;  %v3010_v5 = vld [vmem:[%s2513_s28 + $0x2c] sm:$0x1] }
  0x73   : > { %v2175_v8 = vcombine.low %v341_v63, %v351_v18  ;;  %v503_v32 = vsel %vm2561_vm2, %v501_v15, %v502_v53  ;;  %v506_v10 = vrot.slane %v2909_v37, 5  ;;  %v509_v35 = vrot.slane %v2916_v12, 5 }
  0x74   : > { %v2182_v6 = vcombine.low %v500_v52, %v503_v32  ;;  %v535_v2 = vsel %vm2561_vm2, %v2079_v62, %v534_v54  ;;  %v536_v14 = vrot.slane %v534_v54, 4  ;;  %v712_v16 = vshrl.u32 %v2947_v7, 16 }
  0x75   : > { %1217 = vrot.lane.b32.xlu0 %v2175_v8, %s2439_s5  ;;  %v507_v17 = vsel %vm2561_vm2, %v2075_v4, %v506_v10  ;;  %v508_v9 = vrot.slane %v506_v10, 4  ;;  %v715_v12 = vshll.u32 %v2947_v7, 16  ;;  %v725_v20 = vshrl.u32 %v2955_v45, 16  ;;  %v3019_v10 = vld [vmem:[%s2513_s28 + $0x68] sm:$0x1] }
  0x76   : > { %1263 = vrot.lane.b32.xlu1 %v2186_v1, %s2438_s30  ;;  %v538_v48 = vsel %vm2561_vm2, %v536_v14, %v537_v22  ;;  %v714_v44 = vrot.slane %v712_v16, 4  ;;  %v2194_v13 = vcombine.low %v2947_v7, %v2955_v45  ;;  %v616_v21 = vshrl.u32 %v2962_v3, 16 }
  0x77   : > { %v2187_v23 = vcombine.low %v535_v2, %v538_v48  ;;  %v510_v24 = vsel %vm2561_vm2, %v508_v9, %v509_v35  ;;  %v717_v26 = vrot.slane %v715_v12, 5  ;;  %v619_v28 = vshll.u32 %v2962_v3, 16 }
  0x78   : > { %v2183_v59 = vcombine.low %v507_v17, %v510_v24  ;;  %v618_v33 = vrot.slane %v616_v21, 4  ;;  %v629_v25 = vshrl.u32 %v2973_v40, 16  ;;  %v2190_v34 = vcombine.low %v2962_v3, %v2973_v40 }
  0x79   : > { %1255 = vrot.lane.b32.xlu0 %v2182_v6, %s2438_s30  ;;  %v621_v36 = vrot.slane %v619_v28, 5  ;;  %v736_v38 = vshrl.u32 %v2096_v19, 16  ;;  %v739_v42 = vshll.u32 %v2096_v19, 16  ;;  %v749_v43 = vshrl.u32 %v2983_v27, 16  ;;  %v2112_v28 = vld [vmem:[%s2513_s28 + $0x54] sm:$0xe] }
  0x7a   : > { %1265 = vrot.lane.b32.xlu1 %v2187_v23, %s2438_s30  ;;  %v2195_v41 = vcombine.low %v2096_v19, %v2983_v27  ;;  %v640_v46 = vshrl.u32 %v2989_v31, 16  ;;  %v643_v47 = vshll.u32 %v2989_v31, 16  ;;  %v653_v50 = vshrl.u32 %v2992_v30, 16 }
  0x7b   : > { %v738_v0 = vrot.slane %v736_v38, 4  ;;  %v741_v57 = vrot.slane %v739_v42, 5  ;;  %v2191_v29 = vcombine.low %v2989_v31, %v2992_v30  ;;  %v718_v53 = vor.u32 %v717_v26, %v714_v44  ;;  %v3030_v44 = vld [vmem:[%s2513_s28 + $0x38] sm:$0x1] }
  0x7c   : > { %v642_v55 = vrot.slane %v640_v46, 4  ;;  %v645_v56 = vrot.slane %v643_v47, 5  ;;  %v721_v11 = vshll.u32 %v2955_v45, 16  ;;  %v727_v62 = vrot.slane %v725_v20, 4 }
  0x7d   : > { %1257 = vrot.lane.b32.xlu0 %v2183_v59, %s2438_s30  ;;  %v719_v63 = vrot.slane %v718_v53, 4  ;;  %v731_v1 = vshll.u32 %v3005_v51, 16  ;;  %v622_v52 = vor.u32 %v621_v36, %v618_v33  ;;  %v625_v15 = vshll.u32 %v2973_v40, 16  ;;  %s2068_s30 = sshll.u32 %s220_s27, 3 }
  0x7e   : > { %1311 = vrot.lane.b32.xlu1 %v2194_v13, %s2437_s29  ;;  %v723_v7 = vrot.slane %v721_v11, 5  ;;  %v631_v18 = vrot.slane %v629_v25, 4  ;;  %v635_v54 = vshll.u32 %v3010_v5, 16  ;;  %v742_v22 = vor.u32 %v741_v57, %v738_v0  ;;  %v2113_v0 = vld [vmem:[%s2513_s28 + $0x60] sm:$0xe]  ;;  %s3354_s5 = scalar_lea.vmem %s3484_s4, %s2068_s30 }
  0x7f   : > { %v733_v4 = vrot.slane %v731_v1, 5  ;;  %v623_v8 = vrot.slane %v622_v52, 4  ;;  %v627_v32 = vrot.slane %v625_v15, 5  ;;  %v745_v35 = vshll.u32 %v2983_v27, 16  ;;  %v2109_v1 = vld [vmem:[%s2513_s28 + $0x30] sm:$0xe] }
  0x80   : > { %v724_v3 = vsel %vm2627_vm5, %v719_v63, %v723_v7  ;;  %v728_v6 = vor.u32 %v727_v62, %v723_v7  ;;  %v637_v2 = vrot.slane %v635_v54, 5  ;;  %v743_v14 = vrot.slane %v742_v22, 4  ;;  %v3063_v22 = vld [vmem:[%s2513_s28 + $0x60] sm:$0xf] }
  0x81   : > { %1303 = vrot.lane.b32.xlu0 %v2190_v34, %s2437_s29  ;;  %v628_v16 = vsel %vm2627_vm5, %v623_v8, %v627_v32  ;;  %v632_v17 = vor.u32 %v631_v18, %v627_v32  ;;  %v747_v9 = vrot.slane %v745_v35, 5  ;;  %v751_v12 = vrot.slane %v749_v43, 4  ;;  %v2108_v43 = vld [vmem:[%s2513_s28 + $0x24] sm:$0xe] }
  0x82   : > { %1313 = vrot.lane.b32.xlu1 %v2195_v41, %s2437_s29  ;;  %v729_v20 = vrot.slane %v728_v6, 4  ;;  %v755_v48 = vshll.u32 %v3019_v10, 16  ;;  %v646_v13 = vor.u32 %v645_v56, %v642_v55  ;;  %v649_v21 = vshll.u32 %v2992_v30, 16 }
  0x83   : > { %v633_v19 = vrot.slane %v632_v17, 4  ;;  %v748_v23 = vsel %vm2627_vm5, %v743_v14, %v747_v9  ;;  %v752_v24 = vor.u32 %v751_v12, %v747_v9  ;;  %v655_v26 = vrot.slane %v653_v50, 4 }
  0x84   : > { %v734_v31 = vsel %vm2627_vm5, %v729_v20, %v733_v4  ;;  %v757_v59 = vrot.slane %v755_v48, 5  ;;  %v647_v33 = vrot.slane %v646_v13, 4  ;;  %v651_v25 = vrot.slane %v649_v21, 5  ;;  %v3086_v20 = vld [vmem:[%s2513_s28 + $0x34] sm:$0xf] }
  0x85   : > { %1305 = vrot.lane.b32.xlu0 %v2191_v29, %s2437_s29  ;;  %v2202_v34 = vcombine.low %v724_v3, %v734_v31  ;;  %v638_v36 = vsel %vm2627_vm5, %v633_v19, %v637_v2  ;;  %v753_v38 = vrot.slane %v752_v24, 4  ;;  %v659_v42 = vshll.u32 %v3030_v44, 16  ;;  %v3072_v3 = vld [vmem:[%s2513_s28 + $0x64] sm:$0xf] }
  0x86   : > { %v2198_v41 = vcombine.low %v628_v16, %v638_v36  ;;  %v652_v46 = vsel %vm2627_vm5, %v647_v33, %v651_v25  ;;  %v656_v47 = vor.u32 %v655_v26, %v651_v25  ;;  %v2120_v50 = vrot.slane %v2112_v28, 9  ;;  %v3079_v16 = vld [vmem:[%s2513_s28 + $0x30] sm:$0xf] }
  0x87   : > { %1351 = vrot.lane.b32.xlu1 %v2202_v34, %s2440_s6  ;;  %v758_v57 = vsel %vm2627_vm5, %v753_v38, %v757_v59  ;;  %v661_v29 = vrot.slane %v659_v42, 5  ;;  %v835_v53 = vrot.slane %v2955_v45, 5  ;;  %v838_v55 = vrot.slane %v3005_v51, 5  ;;  %v3101_v28 = vld [vmem:[%s2513_s28 + $0x70] sm:$0xf] }
  0x88   : > { %v2203_v56 = vcombine.low %v748_v23, %v758_v57  ;;  %v657_v11 = vrot.slane %v656_v47, 4  ;;  %v2116_v62 = vrot.slane %v2108_v43, 9  ;;  %v807_v63 = vrot.slane %v2973_v40, 5  ;;  %v3065_v4 = vpop.permute.xlu1 %1307  ;;  %v3095_v23 = vld [vmem:[%s2513_s28 + $0x6c] sm:$0xf] }
  0x89   : > { %1343 = vrot.lane.b32.xlu0 %v2198_v41, %s2440_s6  ;;  %v836_v52 = vsel %vm2561_vm2, %v2120_v50, %v835_v53  ;;  %v837_v15 = vrot.slane %v835_v53, 4  ;;  %v810_v7 = vrot.slane %v3010_v5, 5  ;;  %v2121_v18 = vrot.slane %v2113_v0, 9  ;;  %v3107_v34 = vld [vmem:[%s2513_s28 + $0x3c] sm:$0xf]  ;;  %v3109_v36 = vpop.permute.xlu0 %1299 }
  0x8a   : > { %v662_v45 = vsel %vm2627_vm5, %v657_v11, %v661_v29  ;;  %v808_v51 = vsel %vm2561_vm2, %v2116_v62, %v807_v63  ;;  %v809_v54 = vrot.slane %v807_v63, 4  ;;  %v842_v40 = vrot.slane %v2983_v27, 5  ;;  %v3121_v47 = vld [vmem:[%s2513_s28 + $0x40] sm:$0xf]  ;;  %v3125_v53 = vld [vmem:[%s2513_s28 + $0x68] sm:$0x1] }
  0x8b   : > { %1353 = vrot.lane.b32.xlu1 %v2203_v56, %s2440_s6  ;;  %v2199_v8 = vcombine.low %v652_v46, %v662_v45  ;;  %v839_v5 = vsel %vm2561_vm2, %v837_v15, %v838_v55  ;;  %v845_v32 = vrot.slane %v3019_v10, 5  ;;  %v2117_v35 = vrot.slane %v2109_v1, 9 }
  0x8c   : > { %v2210_v6 = vcombine.low %v836_v52, %v839_v5  ;;  %v811_v27 = vsel %vm2561_vm2, %v809_v54, %v810_v7  ;;  %v843_v2 = vsel %vm2561_vm2, %v2121_v18, %v842_v40  ;;  %v844_v14 = vrot.slane %v842_v40, 4  ;;  %v3111_v38 = vpop.permute.xlu1 %1309  ;;  %v3136_v7 = vld [vmem:[%s2513_s28 + $0x38] sm:$0x1] }
  0x8d   : > { %1345 = vrot.lane.b32.xlu0 %v2199_v8, %s2440_s6  ;;  %v2206_v17 = vcombine.low %v808_v51, %v811_v27  ;;  %v814_v10 = vrot.slane %v2992_v30, 5  ;;  %v817_v9 = vrot.slane %v3030_v44, 5  ;;  %v1020_v12 = vshrl.u32 %v3063_v22, 16  ;;  %s2445_s6 = smov 120  }
  0x8e   : > { %v846_v48 = vsel %vm2561_vm2, %v844_v14, %v845_v32  ;;  %v1023_v13 = vshll.u32 %v3063_v22, 16  ;;  %v1033_v21 = vshrl.u32 %v3072_v3, 16  ;;  %v2218_v19 = vcombine.low %v3063_v22, %v3072_v3  ;;  %v3142_v32 = vpop.permute.xlu0 %1301 }
  0x8f   : > { %1391 = vrot.lane.b32.xlu1 %v2210_v6, %s2441_s7  ;;  %v2211_v30 = vcombine.low %v843_v2, %v846_v48  ;;  %v815_v44 = vsel %vm2561_vm2, %v2117_v35, %v814_v10  ;;  %v816_v24 = vrot.slane %v814_v10, 4  ;;  %v1022_v26 = vrot.slane %v1020_v12, 4  ;;  %v3149_v10 = vld [vmem:[%s2513_s28 + $0x74] sm:$0x1] }
  0x90   : > { %v1025_v31 = vrot.slane %v1023_v13, 5  ;;  %v924_v59 = vshrl.u32 %v3079_v16, 16  ;;  %v927_v33 = vshll.u32 %v3079_v16, 16  ;;  %v937_v25 = vshrl.u32 %v3086_v20, 16 }
  0x91   : > { %1383 = vrot.lane.b32.xlu0 %v2206_v17, %s2441_s7  ;;  %v818_v42 = vsel %vm2561_vm2, %v816_v24, %v817_v9  ;;  %v2214_v43 = vcombine.low %v3079_v16, %v3086_v20  ;;  %v1044_v41 = vshrl.u32 %v3095_v23, 16  ;;  %v1047_v46 = vshll.u32 %v3095_v23, 16 }
  0x92   : > { %v2207_v50 = vcombine.low %v815_v44, %v818_v42  ;;  %v926_v0 = vrot.slane %v924_v59, 4  ;;  %v929_v57 = vrot.slane %v927_v33, 5  ;;  %v1057_v29 = vshrl.u32 %v3101_v28, 16  ;;  %v3160_v59 = vld [vmem:[%s2513_s28 + $0x44] sm:$0x1] }
  0x93   : > { %1393 = vrot.lane.b32.xlu1 %v2211_v30, %s2441_s7  ;;  %v1046_v55 = vrot.slane %v1044_v41, 4  ;;  %v1049_v56 = vrot.slane %v1047_v46, 5  ;;  %v2219_v11 = vcombine.low %v3095_v23, %v3101_v28  ;;  %v948_v62 = vshrl.u32 %v3107_v34, 16  ;;  %v2154_v46 = vld [vmem:[%s2513_s28 + $0x60] sm:$0xe] }
  0x94   : > { %v951_v63 = vshll.u32 %v3107_v34, 16  ;;  %v961_v1 = vshrl.u32 %v3121_v47, 16  ;;  %v2215_v52 = vcombine.low %v3107_v34, %v3121_v47  ;;  %v1026_v15 = vor.u32 %v1025_v31, %v1022_v26  ;;  %v3144_v35 = vpop.permute.xlu1 %1259 }
  0x95   : > { %1385 = vrot.lane.b32.xlu0 %v2207_v50, %s2441_s7  ;;  %v950_v18 = vrot.slane %v948_v62, 4  ;;  %v1029_v45 = vshll.u32 %v3072_v3, 16  ;;  %v1035_v51 = vrot.slane %v1033_v21, 4  ;;  %v1039_v54 = vshll.u32 %v3125_v53, 16  ;;  %v3166_v50 = vpop.permute.xlu0 %1251 }
  0x96   : > { %v953_v40 = vrot.slane %v951_v63, 5  ;;  %v1027_v22 = vrot.slane %v1026_v15, 4  ;;  %v930_v8 = vor.u32 %v929_v57, %v926_v0  ;;  %v933_v5 = vshll.u32 %v3086_v20, 16  ;;  %v2150_v15 = vld [vmem:[%s2513_s28 + $0x30] sm:$0xe] }
  0x97   : > { %1439 = vrot.lane.b32.xlu1 %v2218_v19, %s2442_s8  ;;  %v1031_v6 = vrot.slane %v1029_v45, 5  ;;  %v1041_v27 = vrot.slane %v1039_v54, 5  ;;  %v939_v2 = vrot.slane %v937_v25, 4  ;;  %v943_v14 = vshll.u32 %v3136_v7, 16  ;;  %v2155_v54 = vld [vmem:[%s2513_s28 + $0x6c] sm:$0xe] }
  0x98   : > { %v931_v16 = vrot.slane %v930_v8, 4  ;;  %v935_v17 = vrot.slane %v933_v5, 5  ;;  %v1050_v9 = vor.u32 %v1049_v56, %v1046_v55  ;;  %v1053_v12 = vshll.u32 %v3101_v28, 16  ;;  %v3168_v0 = vpop.permute.xlu1 %1261 }
  0x99   : > { %1431 = vrot.lane.b32.xlu0 %v2214_v43, %s2442_s8  ;;  %v1032_v48 = vsel %vm2627_vm5, %v1027_v22, %v1031_v6  ;;  %v1036_v13 = vor.u32 %v1035_v51, %v1031_v6  ;;  %v945_v21 = vrot.slane %v943_v14, 5  ;;  %v1059_v19 = vrot.slane %v1057_v29, 4 }
  0x9a   : > { %v936_v23 = vsel %vm2627_vm5, %v931_v16, %v935_v17  ;;  %v940_v30 = vor.u32 %v939_v2, %v935_v17  ;;  %v1051_v44 = vrot.slane %v1050_v9, 4  ;;  %v1055_v24 = vrot.slane %v1053_v12, 5  ;;  %v2151_v16 = vld [vmem:[%s2513_s28 + $0x3c] sm:$0xe] }
  0x9b   : > { %1441 = vrot.lane.b32.xlu1 %v2219_v11, %s2442_s8  ;;  %v1037_v26 = vrot.slane %v1036_v13, 4  ;;  %v1063_v31 = vshll.u32 %v3149_v10, 16  ;;  %v954_v33 = vor.u32 %v953_v40, %v950_v18  ;;  %v957_v25 = vshll.u32 %v3121_v47, 16  ;;  %v3191_v13 = vpop.permute.xlu0 %1253 }
  0x9c   : > { %v941_v34 = vrot.slane %v940_v30, 4  ;;  %v1056_v42 = vsel %vm2627_vm5, %v1051_v44, %v1055_v24  ;;  %v1060_v43 = vor.u32 %v1059_v19, %v1055_v24  ;;  %v963_v41 = vrot.slane %v961_v1, 4 }
  0x9d   : > { %1433 = vrot.lane.b32.xlu0 %v2215_v52, %s2442_s8  ;;  %v1042_v57 = vsel %vm2627_vm5, %v1037_v26, %v1041_v27  ;;  %v1065_v29 = vrot.slane %v1063_v31, 5  ;;  %v955_v55 = vrot.slane %v954_v33, 4  ;;  %v959_v56 = vrot.slane %v957_v25, 5 }
  0x9e   : > { %v2226_v11 = vcombine.low %v1032_v48, %v1042_v57  ;;  %v946_v62 = vsel %vm2627_vm5, %v941_v34, %v945_v21  ;;  %v1061_v63 = vrot.slane %v1060_v43, 4  ;;  %v967_v1 = vshll.u32 %v3160_v59, 16 }
  0x9f   : > { %v2222_v18 = vcombine.low %v936_v23, %v946_v62  ;;  %v960_v45 = vsel %vm2627_vm5, %v955_v55, %v959_v56  ;;  %v964_v52 = vor.u32 %v963_v41, %v959_v56  ;;  %v2162_v51 = vrot.slane %v2154_v46, 9 }
  0xa0   : > { %1479 = vrot.lane.b32.xlu1 %v2226_v11, %s2443_s9  ;;  %v1066_v40 = vsel %vm2627_vm5, %v1061_v63, %v1065_v29  ;;  %v969_v22 = vrot.slane %v967_v1, 5  ;;  %v1143_v8 = vrot.slane %v3072_v3, 5  ;;  %v1146_v5 = vrot.slane %v3125_v53, 5  ;;  %v3193_v3 = vpop.permute.xlu1 %1213  ;;  %v2379_v29 = vld [vmem:[%s3481_s1 + $0x8] sm:$0xff]  }
  0xa1   : > { %1471 = vrot.lane.b32.xlu0 %v2222_v18, %s2443_s9  ;;  %v2227_v6 = vcombine.low %v1056_v42, %v1066_v40  ;;  %v965_v27 = vrot.slane %v964_v52, 4  ;;  %v2158_v2 = vrot.slane %v2150_v15, 9  ;;  %v1115_v14 = vrot.slane %v3086_v20, 5  ;;  %v2386_v40 = vld [vmem:[%s2513_s28 + $0x30] sm:$0xf] }
  0xa2   : > { %v1144_v17 = vsel %vm2561_vm2, %v2162_v51, %v1143_v8  ;;  %v1145_v9 = vrot.slane %v1143_v8, 4  ;;  %v1118_v12 = vrot.slane %v3136_v7, 5  ;;  %v2163_v48 = vrot.slane %v2155_v54, 9  ;;  %v2385_v54 = vld [vmem:[%s2513_s28 + $0x34] sm:$0xf] }
  0xa3   : > { %v970_v53 = vsel %vm2627_vm5, %v965_v27, %v969_v22  ;;  %v1116_v21 = vsel %vm2561_vm2, %v2158_v2, %v1115_v14  ;;  %v1117_v19 = vrot.slane %v1115_v14, 4  ;;  %v1150_v20 = vrot.slane %v3101_v28, 5  ;;  %v2388_v27 = vld [vmem:[%s2513_s28] sm:$0xf] }
  0xa4   : > { %1481 = vrot.lane.b32.xlu1 %v2227_v6, %s2443_s9  ;;  %v2223_v23 = vcombine.low %v960_v45, %v970_v53  ;;  %v1147_v7 = vsel %vm2561_vm2, %v1145_v9, %v1146_v5  ;;  %v1153_v30 = vrot.slane %v3149_v10, 5  ;;  %v2159_v44 = vrot.slane %v2151_v16, 9  ;;  %v1212_v41 = vpop.permute.xlu0 %1211  ;;  %v2387_v6 = vld [vmem:[%s2513_s28 + $0x4] sm:$0xf] }
  0xa5   : > { %v2234_v24 = vcombine.low %v1144_v17, %v1147_v7  ;;  %v1119_v58 = vsel %vm2561_vm2, %v1117_v19, %v1118_v12  ;;  %v1151_v26 = vsel %vm2561_vm2, %v2163_v48, %v1150_v20  ;;  %v1152_v31 = vrot.slane %v1150_v20, 4 }
  0xa6   : > { %1473 = vrot.lane.b32.xlu0 %v2223_v23, %s2443_s9  ;;  %v2230_v28 = vcombine.low %v1116_v21, %v1119_v58  ;;  %v1122_v33 = vrot.slane %v3121_v47, 5  ;;  %v1125_v25 = vrot.slane %v3160_v59, 5  ;;  %v2378_v59 = vld [vmem:[%s3481_s1 + $0x10] ss:$0 sps:$4 sm:$0x33]   ;;  %v2168_v22 = vcombine.low %v2386_v40, %v2385_v54 }
  0xa7   : > { %v1154_v34 = vsel %vm2561_vm2, %v1152_v31, %v1153_v30  ;;  %2306 = vmatprep.subr.msk.bf16.mxu0 %vm1711_vm6, %v2378_v59  ;;  %v1713_v11 = vsel %vm1711_vm6, %v2378_v59, 0  ;;  %2307 = vmatprep.subr.msk.bf16.mxu1 %vm1711_vm6, %v2378_v59  ;;  %v2164_v2 = vcombine.low %v2388_v27, %v2387_v6  ;;  %v2390_v23 = vld [vmem:[%s2513_s28 + $0x3c] sm:$0xf] }
  0xa8   : > { %1519 = vrot.lane.b32.xlu1 %v2234_v24, %s2444_s10  ;;  %v2235_v10 = vcombine.low %v1151_v26, %v1154_v34  ;;  %v1123_v42 = vsel %vm2561_vm2, %v2159_v44, %v1122_v33  ;;  %v1124_v43 = vrot.slane %v1122_v33, 4  ;;  %v3216_v46 = vpop.permute.xlu1 %1221  ;;  %2279 = vmatpush3.bf16.msra.mxu0 %v1713_v11  ;;  %v2392_v33 = vld [vmem:[%s2513_s28 + $0xc] sm:$0xf] }
  0xa9   : > { %2303 = vmatpush3.bf16.msra.mxu1 %v1713_v11  ;;  %2280 = vmatprep.subr.bf16.mxu0 %v2379_v29  ;;  %v1526_v9 = vsel %vm1523_vm7, %v2164_v2, %v1212_v41 }
  0xaa   : > { %1511 = vrot.lane.b32.xlu0 %v2230_v28, %s2444_s10  ;;  %v1126_v47 = vsel %vm2561_vm2, %v1124_v43, %v1125_v25  ;;  %2301 = vmatprep.subr.bf16.mxu1 %v2379_v29  ;;  %v1550_v21 = vsel %vm1548_vm8, %v1526_v9, %v3166_v50  ;;  %v2391_v28 = vld [vmem:[%s2513_s28 + $0x10] sm:$0xf] }
  0xab   : > { %v2231_v57 = vcombine.low %v1123_v42, %v1126_v47  ;;  %v1567_v30 = vsel %vm1565_vm9, %v1550_v21, %v3109_v36  ;;  %v2165_v25 = vcombine.low %v2392_v33, %v2391_v28 }
  0xac   : > { %1521 = vrot.lane.b32.xlu1 %v2235_v10, %s2444_s10  ;;  %2281 = vmatpush3.bf16.msra.mxu0 %v2379_v29 }
  0xad   : > { %v1348_v55 = vpop.permute.xlu1 %1347  ;;  %2304 = vmatpush3.bf16.msra.mxu1 %v2379_v29  ;;  %2282 = vmatprep.subr.bf16.mxu0 %v2382_v39  ;;  %v1529_v47 = vsel %vm1523_vm7, %v2165_v25, %v3193_v3 }
  0xae   : > { %1513 = vrot.lane.b32.xlu0 %v2231_v57, %s2444_s10  ;;  %v1220_v56 = vpop.permute.xlu0 %1219  ;;  %2302 = vmatprep.subr.bf16.mxu1 %v2382_v39  ;;  %v1552_v57 = vsel %vm1548_vm8, %v1529_v47, %v3191_v13 }
  0xaf   : > { %v1538_v14 = vsel %vm1523_vm7, %v2168_v22, %v1220_v56  ;;  %v1569_v11 = vsel %vm1565_vm9, %v1552_v57, %v3142_v32 }
  0xb0   : > { %2283 = vmatpush3.bf16.msra.mxu0 %v2382_v39  ;;  %v1558_v17 = vsel %vm1548_vm8, %v1538_v14, %v3144_v35  ;;  %v2389_v35 = vld [vmem:[%s2513_s28 + $0x40] sm:$0xf] }
  0xb1   : > { %2305 = vmatpush3.bf16.msra.mxu1 %v2382_v39  ;;  %v1575_v48 = vsel %vm1565_vm9, %v1558_v17, %v3065_v4  ;;  %v2169_v7 = vcombine.low %v2390_v23, %v2389_v35  ;;  %v2393_v23 = vld [vmem:[%s2513_s28 + $0x48] sm:$0xf] }
  0xb2   : > { %v1340_v62 = vpop.permute.xlu0 %1339  ;;  %v1592_v20 = vsel %vm1582_vm10, %v1575_v48, %v1348_v55 }
  0xb3   : > { %v3232_v63 = vpop.permute.xlu1 %1349  ;;  %v1584_v50 = vsel %vm1582_vm10, %v1567_v30, %v1340_v62  ;;  %v1541_v10 = vsel %vm1523_vm7, %v2169_v7, %v3216_v46  ;;  %v2394_v7 = vld [vmem:[%s2513_s28 + $0x4c] sm:$0xf] }
  0xb4   : > { %v1560_v59 = vsel %vm1548_vm8, %v1541_v10, %v3168_v0  ;;  %v2170_v30 = vcombine.low %v2393_v23, %v2394_v7 }
  0xb5   : > { %v1577_v46 = vsel %vm1565_vm9, %v1560_v59, %v3111_v38 }
  0xb6   : > { %v3234_v1 = vpop.permute.xlu0 %1341  ;;  %v1594_v55 = vsel %vm1582_vm10, %v1577_v46, %v3232_v63 }
  0xb7   : > { %v1388_v15 = vpop.permute.xlu1 %1387  ;;  %v1586_v0 = vsel %vm1582_vm10, %v1569_v11, %v3234_v1 }
  0xb8   : > { %v1609_v4 = vsel %vm1599_vm11, %v1592_v20, %v1388_v15 }
  0xba   : > { %v1380_v18 = vpop.permute.xlu0 %1379 }
  0xbb   : > { %v1390_v45 = vpop.permute.xlu1 %1389  ;;  %v1601_v58 = vsel %vm1599_vm11, %v1584_v50, %v1380_v18 }
  0xbc   : > { %v1611_v56 = vsel %vm1599_vm11, %v1594_v55, %v1390_v45 }
  0xbe   : > { %v3236_v52 = vpop.permute.xlu0 %1381 }
  0xbf   : > { %v1436_v51 = vpop.permute.xlu1 %1435  ;;  %v1603_v38 = vsel %vm1599_vm11, %v1586_v0, %v3236_v52 }
  0xc0   : > { %v1626_v24 = vsel %vm1616_vm12, %v1609_v4, %v1436_v51  ;;  %v2395_v4 = vld [vmem:[%s2513_s28 + $0x18] sm:$0xf] }
  0xc2   : > { %v1428_v8 = vpop.permute.xlu0 %1427 }
  0xc3   : > { %v1438_v5 = vpop.permute.xlu1 %1437  ;;  %v1618_v34 = vsel %vm1616_vm12, %v1601_v58, %v1428_v8 }
  0xc4   : > { %v1628_v3 = vsel %vm1616_vm12, %v1611_v56, %v1438_v5 }
  0xc6   : > { %v1430_v16 = vpop.permute.xlu0 %1429 }
  0xc7   : > { %v1620_v63 = vsel %vm1616_vm12, %v1603_v38, %v1430_v16 }
  0xc8   : > { %v1476_v12 = vpop.permute.xlu1 %1475 }
  0xc9   : > { %v1643_v26 = vsel %vm1633_vm13, %v1626_v24, %v1476_v12  ;;  %v2171_v24 = vcombine.low %v2879_v60, %v2888_v61 }
  0xca   : > { %v1468_v53 = vpop.permute.xlu0 %1467 }
  0xcb   : > { %v1635_v42 = vsel %vm1633_vm13, %v1618_v34, %v1468_v53  ;;  %v2167_v34 = vcombine.low %v2901_v49, %v2909_v37 }
  0xcc   : > { %v1478_v19 = vpop.permute.xlu1 %1477 }
  0xcd   : > { %v1645_v13 = vsel %vm1633_vm13, %v1628_v3, %v1478_v19 }
  0xce   : > { %v1470_v44 = vpop.permute.xlu0 %1469 }
  0xcf   : > { %v1637_v32 = vsel %vm1633_vm13, %v1620_v63, %v1470_v44  ;;  %v2396_v44 = vld [vmem:[%s2513_s28 + $0x1c] sm:$0xf] }
  0xd0   : > { %v1516_v31 = vpop.permute.xlu1 %1515  ;;  %v2166_v50 = vcombine.low %v2395_v4, %v2396_v44 }
  0xd1   : > { %v1660_v36 = vsel %vm1650_vm14, %v1643_v26, %v1516_v31 }
  0xd2   : > { %v1508_v43 = vpop.permute.xlu0 %1507  ;;  %2292 = vmatprep.mubr.msk.bf16.mxu1 %vm1694_vm15, %v1660_v36 }
  0xd3   : > { %v1652_v41 = vsel %vm1650_vm14, %v1635_v42, %v1508_v43 }
  0xd4   : > { %2284 = vmatprep.mubr.msk.bf16.mxu0 %vm1694_vm15, %v1652_v41 }
  0xd8   : > { %v1224_v29 = vpop.permute.xlu1 %1223 }
  0xd9   : > { %v1544_v31 = vsel %vm1523_vm7, %v2170_v30, %v1224_v29 }
  0xdb   : > { %v1216_v39 = vpop.permute.xlu0 %1215 }
  0xdc   : > { %v1518_v62 = vpop.permute.xlu1 %1517  ;;  %v1532_v33 = vsel %vm1523_vm7, %v2166_v50, %v1216_v39 }
  0xdd   : > { %v1662_v15 = vsel %vm1650_vm14, %v1645_v13, %v1518_v62 }
  0xde   : > { %2293 = vmatmul.mubr.msk.bf16.vlgmr.msra.gmra.mxu1 %vm1694_vm15, %v1662_v15 }
  0xdf   : > { %v1510_v18 = vpop.permute.xlu0 %1509 }
  0xe0   : > { %v1654_v45 = vsel %vm1650_vm14, %v1637_v32, %v1510_v18 }
  0xe1   : > { %2285 = vmatmul.mubr.msk.bf16.vlgmr.msra.gmra.mxu0 %vm1694_vm15, %v1654_v45 }
  0xe4   : > { %v1226_v1 = vpop.permute.xlu1 %1225 }
  0xe5   : > { %v1547_v25 = vsel %vm1523_vm7, %v2171_v24, %v1226_v1 }
  0xe7   : > { %v1218_v51 = vpop.permute.xlu0 %1217 }
  0xe8   : > { %v1264_v54 = vpop.permute.xlu1 %1263  ;;  %v1535_v49 = vsel %vm1523_vm7, %v2167_v34, %v1218_v51 }
  0xe9   : > { %v1562_v28 = vsel %vm1548_vm8, %v1544_v31, %v1264_v54 }
  0xeb   : > { %v1256_v40 = vpop.permute.xlu0 %1255 }
  0xec   : > { %v1266_v22 = vpop.permute.xlu1 %1265  ;;  %v1554_v42 = vsel %vm1548_vm8, %v1532_v33, %v1256_v40 }
  0xed   : > { %v1564_v47 = vsel %vm1548_vm8, %v1547_v25, %v1266_v22 }
  0xef   : > { %v1258_v8 = vpop.permute.xlu0 %1257 }
  0xf0   : > { %v1312_v52 = vpop.permute.xlu1 %1311  ;;  %v1556_v56 = vsel %vm1548_vm8, %v1535_v49, %v1258_v8 }
  0xf1   : > { %v1579_v36 = vsel %vm1565_vm9, %v1562_v28, %v1312_v52  ;;  %v3344_v52 = vld [vmem:[%s3482_s2] ss:$0 sm:$0xff] }
  0xf3   : > { %v1304_v5 = vpop.permute.xlu0 %1303 }
  0xf4   : > { %v1314_v6 = vpop.permute.xlu1 %1313  ;;  %v1571_v61 = vsel %vm1565_vm9, %v1554_v42, %v1304_v5  ;;  %v3346_v5 = vstv %s1812_s24 }
  0xf5   : > { %v1581_v37 = vsel %vm1565_vm9, %v1564_v47, %v1314_v6 }
  0xf7   : > { %v1306_v27 = vpop.permute.xlu0 %1305 }
  0xf8   : > { %v1573_v0 = vsel %vm1565_vm9, %v1556_v56, %v1306_v27 }
  0xf9   : > { %v1352_v2 = vpop.permute.xlu1 %1351 }
  0xfa   : > { %v1596_v60 = vsel %vm1582_vm10, %v1579_v36, %v1352_v2 }
  0xfb   : > { %v1344_v14 = vpop.permute.xlu0 %1343 }
  0xfc   : > { %v1588_v59 = vsel %vm1582_vm10, %v1571_v61, %v1344_v14 }
  0xfd   : > { %v1354_v16 = vpop.permute.xlu1 %1353 }
  0xfe   : > { %v1598_v11 = vsel %vm1582_vm10, %v1581_v37, %v1354_v16 }
  0xff   : > { %v1346_v17 = vpop.permute.xlu0 %1345 }
 0x100   : > { %v1590_v15 = vsel %vm1582_vm10, %v1573_v0, %v1346_v17 }
 0x101   : > { %v1392_v9 = vpop.permute.xlu1 %1391 }
 0x102   : > { %v1613_v43 = vsel %vm1599_vm11, %v1596_v60, %v1392_v9 }
 0x103   : > { %v1384_v12 = vpop.permute.xlu0 %1383 }
 0x104   : > { %v1605_v46 = vsel %vm1599_vm11, %v1588_v59, %v1384_v12 }
 0x105   : > { %v1394_v48 = vpop.permute.xlu1 %1393 }
 0x106   : > { %v1615_v13 = vsel %vm1599_vm11, %v1598_v11, %v1394_v48 }
 0x107   : > { %v1386_v53 = vpop.permute.xlu0 %1385 }
 0x108   : > { %v1607_v18 = vsel %vm1599_vm11, %v1590_v15, %v1386_v53 }
 0x109   : > { %v1440_v21 = vpop.permute.xlu1 %1439 }
 0x10a   : > { %v1630_v57 = vsel %vm1616_vm12, %v1613_v43, %v1440_v21 }
 0x10b   : > { %v1432_v19 = vpop.permute.xlu0 %1431 }
 0x10c   : > { %v1622_v3 = vsel %vm1616_vm12, %v1605_v46, %v1432_v19 }
 0x10d   : > { %v1442_v20 = vpop.permute.xlu1 %1441 }
 0x10e   : > { %v1632_v63 = vsel %vm1616_vm12, %v1615_v13, %v1442_v20 }
 0x10f   : > { %v1434_v35 = vpop.permute.xlu0 %1433 }
 0x110   : > { %v1624_v51 = vsel %vm1616_vm12, %v1607_v18, %v1434_v35 }
 0x112   : > { %v1480_v58 = vpop.permute.xlu1 %1479 }
 0x113   : > { %v1472_v26 = vpop.permute.xlu0 %1471  ;;  %v1647_v29 = vsel %vm1633_vm13, %v1630_v57, %v1480_v58 }
 0x114   : > { %v1639_v62 = vsel %vm1633_vm13, %v1622_v3, %v1472_v26 }
 0x116   : > { %v1482_v10 = vpop.permute.xlu1 %1481 }
 0x117   : > { %v1649_v45 = vsel %vm1633_vm13, %v1632_v63, %v1482_v10 }
 0x118   : > { %v1474_v41 = vpop.permute.xlu0 %1473 }
 0x119   : > { %v1641_v40 = vsel %vm1633_vm13, %v1624_v51, %v1474_v41 }
 0x11a   : > { %v1520_v55 = vpop.permute.xlu1 %1519 }
 0x11b   : > { %v1664_v39 = vsel %vm1650_vm14, %v1647_v29, %v1520_v55 }
 0x11c   : > { %v1512_v38 = vpop.permute.xlu0 %1511  ;;  %2296 = vmatprep.mubr.msk.bf16.mxu1 %vm1694_vm15, %v1664_v39 }
 0x11d   : > { %v1656_v32 = vsel %vm1650_vm14, %v1639_v62, %v1512_v38 }
 0x11e   : > { %2288 = vmatprep.mubr.msk.bf16.mxu0 %vm1694_vm15, %v1656_v32  ;;  %v1522_v1 = vpop.permute.xlu1 %1521 }
 0x11f   : > { %v1666_v54 = vsel %vm1650_vm14, %v1649_v45, %v1522_v1 }
 0x120   : > { %v1514_v22 = vpop.permute.xlu0 %1513  ;;  %2297 = vmatmul.mubr.msk.bf16.gmra.mxu1 %vm1694_vm15, %v1666_v54 }
 0x121   : > { %v1658_v8 = vsel %vm1650_vm14, %v1641_v40, %v1514_v22 }
 0x122   : > { %2289 = vmatmul.mubr.msk.bf16.gmra.mxu0 %vm1694_vm15, %v1658_v8 }
 0x19e   : > { %v2294_v6 = vpop.f32.mrf.mxu1 }
 0x19f   : > { %v1790_v27 = vadd.f32 %v2294_v6, %v3344_v52 }
 0x1a0   : > { %v1781_v2 = vpop.f32.mrf.mxu1 }
 0x1a1   : > { %v2286_v14 = vpop.f32.mrf.mxu0  ;;  %v1840_v16 = vmul.f32 %v3346_v5, %v1790_v27  ;;  %v1782_v17 = vadd.f32 %v3344_v52, %v1781_v2  ;;  %vm1823_vm0 = vcmp.ge.f32.partialorder %v1790_v27, 0.0 }
 0x1a2   : > { %v1758_v9 = vadd.f32 %v2286_v14, %v3344_v52  ;;  %v2295_v12 = vpop.f32.mrf.mxu1 }
 0x1a3   : > { %v1749_v48 = vpop.f32.mrf.mxu0  ;;  %v1838_v53 = vmul.f32 %v3346_v5, %v1782_v17  ;;  %v1793_v21 = vadd.f32 %v2295_v12, %v3344_v52  ;;  %v1856_v19 = vsel %vm1823_vm0, %v1790_v27, %v1840_v16  ;;  %vm1821_vm1 = vcmp.ge.f32.partialorder %v1782_v17, 0.0 }
 0x1a4   : > { %v1832_v20 = vmul.f32 %v3346_v5, %v1758_v9  ;;  %v1750_v35 = vadd.f32 %v3344_v52, %v1749_v48  ;;  %v1784_v23 = vpop.f32.mrf.mxu1  ;;  %vm1815_vm2 = vcmp.ge.f32.partialorder %v1758_v9, 0.0  ;;  %1872 = vst.msk [vmem:[%s3354_s5 + $0xa0] sm:$0xff] %vm1548_vm8, %v1856_v19 }
 0x1a5   : > { %v2287_v7 = vpop.f32.mrf.mxu0  ;;  %v1841_v30 = vmul.f32 %v3346_v5, %v1793_v21  ;;  %v1785_v4 = vadd.f32 %v3344_v52, %v1784_v23  ;;  %vm1824_vm3 = vcmp.ge.f32.partialorder %v1793_v21, 0.0  ;;  %v1854_v44 = vsel %vm1821_vm1, %v1782_v17, %v1838_v53 }
 0x1a6   : > { %v1830_v50 = vmul.f32 %v3346_v5, %v1750_v35  ;;  %v1761_v24 = vadd.f32 %v2287_v7, %v3344_v52  ;;  %v1848_v58 = vsel %vm1815_vm2, %v1758_v9, %v1832_v20  ;;  %vm1813_vm4 = vcmp.ge.f32.partialorder %v1750_v35, 0.0  ;;  %1870 = vst.msk [vmem:[%s3354_s5 + $0x80] sm:$0xff] %vm1548_vm8, %v1854_v44 }
 0x1a7   : > { %v1839_v26 = vmul.f32 %v3346_v5, %v1785_v4  ;;  %1898 = vrot.lane.b32.xlu0 %v1848_v58, %s2445_s6  ;;  %1864 = vst.msk [vmem:[%s3354_s5 + $0x20] sm:$0xff] %vm1548_vm8, %v1848_v58  ;;  %v1752_v31 = vpop.f32.mrf.mxu0  ;;  %v1857_v28 = vsel %vm1824_vm3, %v1793_v21, %v1841_v30  ;;  %vm1822_vm5 = vcmp.ge.f32.partialorder %v1785_v4, 0.0 }
 0x1a8   : > { %v1833_v33 = vmul.f32 %v3346_v5, %v1761_v24  ;;  %v1753_v25 = vadd.f32 %v3344_v52, %v1752_v31  ;;  %vm1816_vm6 = vcmp.ge.f32.partialorder %v1761_v24, 0.0  ;;  %1873 = vst.msk [vmem:[%s3354_s5 + $0xa8] sm:$0xff] %vm1548_vm8, %v1857_v28  ;;  %v1846_v34 = vsel %vm1813_vm4, %v1750_v35, %v1830_v50 }
 0x1a9   : > { %1862 = vst.msk [vmem:[%s3354_s5] sm:$0xff] %vm1548_vm8, %v1846_v34  ;;  %v1855_v36 = vsel %vm1822_vm5, %v1785_v4, %v1839_v26 }
 0x1aa   : > { %v1831_v10 = vmul.f32 %v3346_v5, %v1753_v25  ;;  %v1849_v42 = vsel %vm1816_vm6, %v1761_v24, %v1833_v33  ;;  %vm1814_vm7 = vcmp.ge.f32.partialorder %v1753_v25, 0.0  ;;  %1871 = vst.msk [vmem:[%s3354_s5 + $0x88] sm:$0xff] %vm1548_vm8, %v1855_v36 }
 0x1ab   : > { %1914 = vrot.lane.b32.xlu0 %v1856_v19, %s2445_s6  ;;  %1900 = vrot.lane.b32.xlu1 %v1849_v42, %s2445_s6  ;;  %1865 = vst.msk [vmem:[%s3354_s5 + $0x28] sm:$0xff] %vm1548_vm8, %v1849_v42 }
 0x1ac   : > { %v1847_v60 = vsel %vm1814_vm7, %v1753_v25, %v1831_v10 }
 0x1ad   : > { %1863 = vst.msk [vmem:[%s3354_s5 + $0x8] sm:$0xff] %vm1548_vm8, %v1847_v60 }
 0x1af   : > { %1916 = vrot.lane.b32.xlu1 %v1857_v28, %s2445_s6  ;;  %1894 = vrot.lane.b32.xlu0 %v1846_v34, %s2445_s6 }
 0x1b3   : > { %1896 = vrot.lane.b32.xlu1 %v1847_v60, %s2445_s6  ;;  %1910 = vrot.lane.b32.xlu0 %v1854_v44, %s2445_s6 }
 0x1b7   : > { %1912 = vrot.lane.b32.xlu1 %v1855_v36, %s2445_s6 }
 0x1e0   : > { %v2298_v61 = vpop.f32.mrf.mxu1 }
 0x1e1   : > { %v1806_v43 = vadd.f32 %v2298_v61, %v3344_v52 }
 0x1e2   : > { %v2290_v41 = vpop.f32.mrf.mxu0  ;;  %v1797_v47 = vpop.f32.mrf.mxu1 }
 0x1e3   : > { %v1774_v59 = vadd.f32 %v2290_v41, %v3344_v52  ;;  %v1844_v57 = vmul.f32 %v3346_v5, %v1806_v43  ;;  %v1798_v49 = vadd.f32 %v3344_v52, %v1797_v47  ;;  %vm1827_vm9 = vcmp.ge.f32.partialorder %v1806_v43, 0.0 }
 0x1e4   : > { %v1765_v37 = vpop.f32.mrf.mxu0  ;;  %v2299_v46 = vpop.f32.mrf.mxu1 }
 0x1e5   : > { %v1836_v29 = vmul.f32 %v3346_v5, %v1774_v59  ;;  %v1766_v55 = vadd.f32 %v3344_v52, %v1765_v37  ;;  %v1842_v56 = vmul.f32 %v3346_v5, %v1798_v49  ;;  %v1809_v11 = vadd.f32 %v2299_v46, %v3344_v52 }
 0x1e6   : > { %v2291_v3 = vpop.f32.mrf.mxu0  ;;  %v1800_v39 = vpop.f32.mrf.mxu1  ;;  %vm1819_vm10 = vcmp.ge.f32.partialorder %v1774_v59, 0.0  ;;  %vm1825_vm11 = vcmp.ge.f32.partialorder %v1798_v49, 0.0  ;;  %v1860_v0 = vsel %vm1827_vm9, %v1806_v43, %v1844_v57 }
 0x1e7   : > { %v1834_v13 = vmul.f32 %v3346_v5, %v1766_v55  ;;  %v1777_v62 = vadd.f32 %v2291_v3, %v3344_v52  ;;  %v1845_v38 = vmul.f32 %v3346_v5, %v1809_v11  ;;  %v1801_v15 = vadd.f32 %v3344_v52, %v1800_v39  ;;  %1876 = vst.msk [vmem:[%s3354_s5 + $0xe0] sm:$0xff] %vm1548_vm8, %v1860_v0 }
 0x1e8   : > { %v1852_v63 = vsel %vm1819_vm10, %v1774_v59, %v1836_v29  ;;  %v1768_v32 = vpop.f32.mrf.mxu0  ;;  %vm1817_vm12 = vcmp.ge.f32.partialorder %v1766_v55, 0.0  ;;  %v1858_v18 = vsel %vm1825_vm11, %v1798_v49, %v1842_v56  ;;  %vm1828_vm13 = vcmp.ge.f32.partialorder %v1809_v11, 0.0 }
 0x1e9   : > { %v1837_v45 = vmul.f32 %v3346_v5, %v1777_v62  ;;  %v1843_v1 = vmul.f32 %v3346_v5, %v1801_v15  ;;  %1906 = vrot.lane.b32.xlu0 %v1852_v63, %s2445_s6  ;;  %1868 = vst.msk [vmem:[%s3354_s5 + $0x60] sm:$0xff] %vm1548_vm8, %v1852_v63  ;;  %v1769_v51 = vadd.f32 %v3344_v52, %v1768_v32  ;;  %vm1820_vm14 = vcmp.ge.f32.partialorder %v1777_v62, 0.0 }
 0x1ea   : > { %1874 = vst.msk [vmem:[%s3354_s5 + $0xc0] sm:$0xff] %vm1548_vm8, %v1858_v18  ;;  %v1850_v54 = vsel %vm1817_vm12, %v1766_v55, %v1834_v13  ;;  %vm1826_vm15 = vcmp.ge.f32.partialorder %v1801_v15, 0.0  ;;  %v1861_v40 = vsel %vm1828_vm13, %v1809_v11, %v1845_v38 }
 0x1eb   : > { %v1835_v22 = vmul.f32 %v3346_v5, %v1769_v51  ;;  %v1853_v8 = vsel %vm1820_vm14, %v1777_v62, %v1837_v45  ;;  %1866 = vst.msk [vmem:[%s3354_s5 + $0x40] sm:$0xff] %vm1548_vm8, %v1850_v54  ;;  %vm1818_vm0 = vcmp.ge.f32.partialorder %v1769_v51, 0.0  ;;  %v1859_v6 = vsel %vm1826_vm15, %v1801_v15, %v1843_v1  ;;  %1877 = vst.msk [vmem:[%s3354_s5 + $0xe8] sm:$0xff] %vm1548_vm8, %v1861_v40 }
 0x1ec   : > { %1908 = vrot.lane.b32.xlu1 %v1853_v8, %s2445_s6  ;;  %1869 = vst.msk [vmem:[%s3354_s5 + $0x68] sm:$0xff] %vm1548_vm8, %v1853_v8  ;;  %1875 = vst.msk [vmem:[%s3354_s5 + $0xc8] sm:$0xff] %vm1548_vm8, %v1859_v6 }
 0x1ed   : > { %1902 = vrot.lane.b32.xlu0 %v1850_v54, %s2445_s6  ;;  %v1851_v52 = vsel %vm1818_vm0, %v1769_v51, %v1835_v22 }
 0x1ee   : > { %1867 = vst.msk [vmem:[%s3354_s5 + $0x48] sm:$0xff] %vm1548_vm8, %v1851_v52 }
 0x1f0   : > { %1904 = vrot.lane.b32.xlu1 %v1851_v52, %s2445_s6 }
 0x1f1   : > { %1918 = vrot.lane.b32.xlu0 %v1858_v18, %s2445_s6 }
 0x1f4   : > { %1920 = vrot.lane.b32.xlu1 %v1859_v6, %s2445_s6 }
 0x1f5   : > { %1922 = vrot.lane.b32.xlu0 %v1860_v0, %s2445_s6 }
 0x1f8   : > { %1924 = vrot.lane.b32.xlu1 %v1861_v40, %s2445_s6 }
 0x219   : > { %v1899_v5 = vpop.permute.xlu0 %1898 }
 0x21a   : > { %2250 = vst.msk [vmem:[%s3354_s5 + $0x30] sm:$0xff] %vm1548_vm8, %v1899_v5 }
 0x21d   : > { %v1901_v27 = vpop.permute.xlu1 %1900  ;;  %v1915_v2 = vpop.permute.xlu0 %1914 }
 0x21e   : > { %2251 = vst.msk [vmem:[%s3354_s5 + $0x38] sm:$0xff] %vm1548_vm8, %v1901_v27  ;;  %2258 = vst.msk [vmem:[%s3354_s5 + $0xb0] sm:$0xff] %vm1548_vm8, %v1915_v2 }
 0x221   : > { %v1917_v14 = vpop.permute.xlu1 %1916  ;;  %v1895_v16 = vpop.permute.xlu0 %1894 }
 0x222   : > { %2259 = vst.msk [vmem:[%s3354_s5 + $0xb8] sm:$0xff] %vm1548_vm8, %v1917_v14  ;;  %2248 = vst.msk [vmem:[%s3354_s5 + $0x10] sm:$0xff] %vm1548_vm8, %v1895_v16 }
 0x225   : > { %v1897_v17 = vpop.permute.xlu1 %1896  ;;  %v1911_v9 = vpop.permute.xlu0 %1910 }
 0x226   : > { %2249 = vst.msk [vmem:[%s3354_s5 + $0x18] sm:$0xff] %vm1548_vm8, %v1897_v17  ;;  %2256 = vst.msk [vmem:[%s3354_s5 + $0x90] sm:$0xff] %vm1548_vm8, %v1911_v9 }
 0x229   : > { %v1913_v12 = vpop.permute.xlu1 %1912 }
 0x22a   : > { %2257 = vst.msk [vmem:[%s3354_s5 + $0x98] sm:$0xff] %vm1548_vm8, %v1913_v12 }
 0x25b   : > { %v1907_v48 = vpop.permute.xlu0 %1906 }
 0x25c   : > { %2254 = vst.msk [vmem:[%s3354_s5 + $0x70] sm:$0xff] %vm1548_vm8, %v1907_v48 }
 0x25e   : > { %v1909_v53 = vpop.permute.xlu1 %1908 }
 0x25f   : > { %2255 = vst.msk [vmem:[%s3354_s5 + $0x78] sm:$0xff] %vm1548_vm8, %v1909_v53  ;;  %v1903_v21 = vpop.permute.xlu0 %1902 }
 0x260   : > { %2252 = vst.msk [vmem:[%s3354_s5 + $0x50] sm:$0xff] %vm1548_vm8, %v1903_v21 }
 0x262   : > { %v1905_v19 = vpop.permute.xlu1 %1904 }
 0x263   : > { %2253 = vst.msk [vmem:[%s3354_s5 + $0x58] sm:$0xff] %vm1548_vm8, %v1905_v19  ;;  %v1919_v20 = vpop.permute.xlu0 %1918 }
 0x264   : > { %2260 = vst.msk [vmem:[%s3354_s5 + $0xd0] sm:$0xff] %vm1548_vm8, %v1919_v20 }
 0x266   : > { %v1921_v35 = vpop.permute.xlu1 %1920 }
 0x267   : > { %2261 = vst.msk [vmem:[%s3354_s5 + $0xd8] sm:$0xff] %vm1548_vm8, %v1921_v35  ;;  %v1923_v23 = vpop.permute.xlu0 %1922 }
 0x268   : > { %2262 = vst.msk [vmem:[%s3354_s5 + $0xf0] sm:$0xff] %vm1548_vm8, %v1923_v23 }
 0x26a   : > { %v1925_v7 = vpop.permute.xlu1 %1924 }
 0x26b   : > { %2263 = vst.msk [vmem:[%s3354_s5 + $0xf8] sm:$0xff] %vm1548_vm8, %v1925_v7 }
 0x26c PF: > { %s15_s21 = sadd.s32 1, %s2435_s21   ;;  %s3489_s17 = smov %s2427_s19 }
 0x26d   : > { %p12_p7 = scmp.ge.s32.totalorder %s15_s21, 6   ;;  %s3490_s18 = smov %s2431_s20 }
 0x26e   : > { %s3491_s19 = smov %s3494_s3  ;;  %s3492_s20 = smov %s3498_s22 }
 0x26f   :  { %14 = sbr.rel (!%p12_p7) target bundleno = 3 (0x3), region = 70 }

</bundles_post_ra>
